<compile_context>
chip_gen: v7x
topology: tpu7x:2x2x1
jax: 0.10.0
libtpu: 0.0.40
codegen_flags: <defaults>
</compile_context>

<pallas_src>
import functools
import math

import jax
import jax.numpy as jnp
from jax import lax
from jax.experimental import pallas as pl
from jax.experimental.pallas import tpu as pltpu


def _mha_kernel(x_ref, k_ref, v_ref,
                wq_ref, bq_ref, wk_ref, bk_ref, wv_ref, bv_ref,
                wo_ref, bo_ref,
                o_ref, attn_ref,
                acc_ref,
                *, scale, head_dim, heads_per_group, compute_dtype):
    # x_ref: (1, tq, D)   k_ref/v_ref: (1, Skv, D)            (compute_dtype)
    # wq/wk/wv: (D, ghd)  bq/bk/bv: (1, ghd) f32              ghd = hpg*hd
    # wo: (ghd, D)        bo: (1, D) f32
    # o_ref: (1, tq, D)   attn_ref: (1, hpg, tq, Skv)
    # acc_ref: (tq, D) f32 scratch (out-projection accumulator over groups)
    g = pl.program_id(2)

    x = x_ref[0]            # (tq, D)
    kin = k_ref[0]          # (Skv, D)
    vin = v_ref[0]          # (Skv, D)

    # Group projections: bf16 operands on the MXU (lane-dense 128-wide output),
    # f32 accumulation, f32 bias add.
    q = jnp.dot(x, wq_ref[...], preferred_element_type=jnp.float32) + bq_ref[...]
    k = jnp.dot(kin, wk_ref[...], preferred_element_type=jnp.float32) + bk_ref[...]
    v = jnp.dot(vin, wv_ref[...], preferred_element_type=jnp.float32) + bv_ref[...]

    ctx_parts = []
    for h in range(heads_per_group):            # static, tiny (1 or 2)
        lo = h * head_dim
        qh = q[:, lo:lo + head_dim]             # (tq, hd)  f32
        kh = k[:, lo:lo + head_dim]             # (Skv, hd) f32
        vh = v[:, lo:lo + head_dim]             # (Skv, hd) f32

        # Scaled dot-product scores: q @ k^T (contract on head_dim), f32 softmax.
        s = lax.dot_general(
            qh.astype(compute_dtype), kh.astype(compute_dtype),
            dimension_numbers=(((1,), (1,)), ((), ())),
            preferred_element_type=jnp.float32) * scale       # (tq, Skv)
        s = s - jnp.max(s, axis=-1, keepdims=True)
        p = jnp.exp(s)
        w = p * pl.reciprocal(jnp.sum(p, axis=-1, keepdims=True), approx=False)

        attn_ref[0, h] = w.astype(attn_ref.dtype)

        # context_h = softmax(scores) @ V_h   -> (tq, hd)
        ctx_parts.append(jnp.dot(w.astype(compute_dtype), vh.astype(compute_dtype),
                                 preferred_element_type=jnp.float32))

    ctx = ctx_parts[0] if len(ctx_parts) == 1 else jnp.concatenate(ctx_parts, axis=-1)

    # out_proj accumulated over head groups: out = sum_g ctx_g @ Wo[g_rows,:] + bo
    @pl.when(g == 0)
    def _():
        acc_ref[...] = jnp.broadcast_to(bo_ref[...], acc_ref.shape)

    acc_ref[...] += jnp.dot(ctx.astype(compute_dtype), wo_ref[...],
                            preferred_element_type=jnp.float32)

    @pl.when(g == pl.num_programs(2) - 1)
    def _():
        o_ref[0] = acc_ref[...].astype(o_ref.dtype)


@functools.partial(jax.jit, static_argnames=("num_heads", "block_q", "compute_dtype"))
def multi_head_attention(x, k, v, wq, bq, wk, bk, wv, bv, wo, bo,
                         *, num_heads, block_q=None,
                         compute_dtype=jnp.bfloat16):
    """x: (B, Sq, D); k, v: (B, Skv, D); weights stored (in, out); biases (D,)."""
    B, Sq, D = x.shape
    Skv = k.shape[1]
    assert D % num_heads == 0
    hd = D // num_heads
    scale = 1.0 / math.sqrt(hd)   # forward() uses head_dim**0.5

    # Head grouping so weight tiles are lane-dense (>=128 lanes) when hd < 128.
    hpg = max(1, 128 // hd)
    while hpg > 1 and num_heads % hpg != 0:
        hpg -= 1
    ghd = hpg * hd
    n_groups = num_heads // hpg

    # Query-row tile: for production shapes use 256-1024; here it just equals
    # the (tiny) full sequence.
    if block_q is None:
        block_q = Sq if Sq <= 256 else 256
    block_q = min(block_q, Sq)
    assert Sq % block_q == 0

    # bf16 matmul operands, f32 biases.
    xc = x.astype(compute_dtype)
    kc = k.astype(compute_dtype)
    vc = v.astype(compute_dtype)
    wqc, wkc, wvc, woc = (w.astype(compute_dtype) for w in (wq, wk, wv, wo))
    bq2, bk2, bv2, bo2 = (b.reshape(1, -1).astype(jnp.float32)
                          for b in (bq, bk, bv, bo))

    grid = (B, Sq // block_q, n_groups)

    itemsize = jnp.dtype(compute_dtype).itemsize
    w_bytes = 4 * D * D * itemsize + 4 * D * 4
    act_bytes = (B * Sq * D + 2 * B * Skv * D) * itemsize
    out_bytes = B * Sq * D * 4 + B * num_heads * Sq * Skv * 4
    flops = 2 * B * (Sq * D * D + 2 * Skv * D * D + 2 * Sq * Skv * D + Sq * D * D)

    out, attn = pl.pallas_call(
        functools.partial(_mha_kernel, scale=scale, head_dim=hd,
                          heads_per_group=hpg, compute_dtype=compute_dtype),
        out_shape=(
            jax.ShapeDtypeStruct((B, Sq, D), jnp.float32),
            jax.ShapeDtypeStruct((B, num_heads, Sq, Skv), jnp.float32),
        ),
        grid_spec=pltpu.PrefetchScalarGridSpec(
            num_scalar_prefetch=0,
            grid=grid,
            in_specs=[
                pl.BlockSpec((1, block_q, D), lambda b, qi, g: (b, qi, 0)),  # x
                pl.BlockSpec((1, Skv, D),     lambda b, qi, g: (b, 0, 0)),   # k
                pl.BlockSpec((1, Skv, D),     lambda b, qi, g: (b, 0, 0)),   # v
                pl.BlockSpec((D, ghd),        lambda b, qi, g: (0, g)),      # Wq (group cols)
                pl.BlockSpec((1, ghd),        lambda b, qi, g: (0, g)),      # bq
                pl.BlockSpec((D, ghd),        lambda b, qi, g: (0, g)),      # Wk
                pl.BlockSpec((1, ghd),        lambda b, qi, g: (0, g)),      # bk
                pl.BlockSpec((D, ghd),        lambda b, qi, g: (0, g)),      # Wv
                pl.BlockSpec((1, ghd),        lambda b, qi, g: (0, g)),      # bv
                pl.BlockSpec((ghd, D),        lambda b, qi, g: (g, 0)),      # Wo (group rows)
                pl.BlockSpec((1, D),          lambda b, qi, g: (0, 0)),      # bo
            ],
            out_specs=[
                pl.BlockSpec((1, block_q, D),        lambda b, qi, g: (b, qi, 0)),
                pl.BlockSpec((1, hpg, block_q, Skv), lambda b, qi, g: (b, g, qi, 0)),
            ],
            scratch_shapes=[pltpu.VMEM((block_q, D), jnp.float32)],
        ),
        compiler_params=pltpu.CompilerParams(
            dimension_semantics=("parallel", "parallel", "arbitrary"),
            vmem_limit_bytes=64 * 1024 * 1024,
        ),
        cost_estimate=pl.CostEstimate(
            flops=flops,
            transcendentals=B * num_heads * Sq * Skv,
            bytes_accessed=w_bytes + act_bytes + out_bytes,
        ),
    )(xc, kc, vc, wqc, bq2, wkc, bk2, wvc, bv2, woc, bo2)

    return out.astype(x.dtype), attn


def init_mha_params(key, embed_dim, dtype=jnp.float32):
    """nn.Linear-style uniform(-1/sqrt(fan_in), 1/sqrt(fan_in)); weights stored (in, out)."""
    ks = jax.random.split(key, 8)
    bound = 1.0 / math.sqrt(embed_dim)

    def lin(kw, kb):
        w = jax.random.uniform(kw, (embed_dim, embed_dim), dtype, -bound, bound)
        b = jax.random.uniform(kb, (embed_dim,), dtype, -bound, bound)
        return w, b

    wq, bq = lin(ks[0], ks[1])
    wk, bk = lin(ks[2], ks[3])
    wv, bv = lin(ks[4], ks[5])
    wo, bo = lin(ks[6], ks[7])
    return wq, bq, wk, bk, wv, bv, wo, bo


def mha_reference(x, k, v, wq, bq, wk, bk, wv, bv, wo, bo, num_heads):
    """Pure-JAX f32 reference matching the PyTorch forward."""
    B, Sq, D = x.shape
    Skv = k.shape[1]
    hd = D // num_heads
    q = x @ wq + bq
    kk = k @ wk + bk
    vv = v @ wv + bv

    def split(t, S):
        return t.reshape(B, S, num_heads, hd).transpose(0, 2, 1, 3)

    qh, kh, vh = split(q, Sq), split(kk, Skv), split(vv, Skv)
    scores = jnp.einsum("bhqd,bhkd->bhqk", qh, kh) / math.sqrt(hd)
    w = jax.nn.softmax(scores, axis=-1)
    ctx = jnp.einsum("bhqk,bhkd->bhqd", w, vh)
    ctx = ctx.transpose(0, 2, 1, 3).reshape(B, Sq, D)
    return ctx @ wo + bo, w


if __name__ == "__main__":
    key = jax.random.PRNGKey(0)
    # Small demo shapes matching the module spec: embed_dim=512, num_heads=8
    # (head_dim=64 -> 2 heads per lane-dense group); short sublane-aligned seq.
    batch, seq, embed_dim, num_heads = 2, 8, 512, 8

    kx, ke, kp = jax.random.split(key, 3)
    x = jax.random.normal(kx, (batch, seq, embed_dim), jnp.float32)
    enc = jax.random.normal(ke, (batch, seq, embed_dim), jnp.float32)
    params = init_mha_params(kp, embed_dim)

    # Self-attention: forward(x) -> k = v = x.
    out, attn = multi_head_attention(x, x, x, *params, num_heads=num_heads)
    out = jax.block_until_ready(out)

    ref_out, ref_attn = mha_reference(x, x, x, *params, num_heads=num_heads)
    assert out.shape == (batch, seq, embed_dim)
    assert attn.shape == (batch, num_heads, seq, seq)
    assert jnp.allclose(attn.sum(-1), 1.0, atol=1e-3), "softmax rows must sum to 1"
    # bf16 operands vs f32 reference -> loose-but-tight-enough tolerance.
    assert jnp.allclose(out, ref_out, atol=3e-2, rtol=3e-2), "output mismatch"
    assert jnp.allclose(attn, ref_attn, atol=2e-2, rtol=2e-2), "attn-weight mismatch"

    # Cross-attention: forward(x, k=encoder_output, v=encoder_output).
    out_x, attn_x = multi_head_attention(x, enc, enc, *params, num_heads=num_heads)
    out_x = jax.block_until_ready(out_x)
    ref_out_x, ref_attn_x = mha_reference(x, enc, enc, *params, num_heads=num_heads)
    assert jnp.allclose(out_x, ref_out_x, atol=3e-2, rtol=3e-2), "cross-attn mismatch"
    assert jnp.allclose(attn_x, ref_attn_x, atol=2e-2, rtol=2e-2), "cross-attn weights mismatch"

    print("KERNEL_OK")
</pallas_src>

<mosaic_0001>
module attributes {stable_mosaic.version = 11 : i64} {
  func.func @_mha_kernel(%arg0: i32, %arg1: i32, %arg2: i32, %arg3: memref<1x8x512xbf16, #tpu.memory_space<vmem>>, %arg4: memref<1x8x512xbf16, #tpu.memory_space<vmem>>, %arg5: memref<1x8x512xbf16, #tpu.memory_space<vmem>>, %arg6: memref<512x128xbf16, #tpu.memory_space<vmem>>, %arg7: memref<1x128xf32, #tpu.memory_space<vmem>>, %arg8: memref<512x128xbf16, #tpu.memory_space<vmem>>, %arg9: memref<1x128xf32, #tpu.memory_space<vmem>>, %arg10: memref<512x128xbf16, #tpu.memory_space<vmem>>, %arg11: memref<1x128xf32, #tpu.memory_space<vmem>>, %arg12: memref<128x512xbf16, #tpu.memory_space<vmem>>, %arg13: memref<1x512xf32, #tpu.memory_space<vmem>>, %arg14: memref<1x8x512xf32, #tpu.memory_space<vmem>>, %arg15: memref<1x2x8x8xf32, #tpu.memory_space<vmem>>, %arg16: memref<8x512xf32, #tpu.memory_space<vmem>>) attributes {dimension_semantics = [#tpu.dimension_semantics<parallel>, #tpu.dimension_semantics<parallel>, #tpu.dimension_semantics<arbitrary>], iteration_bounds = array<i64: 2, 1, 4>, scalar_prefetch = 0 : i64, scratch_operands = 1 : i64, tpu.core_type = #tpu.core_type<tc>, window_params = [{transform_indices = @transform_0, window_bounds = array<i64: 1, 8, 512>}, {transform_indices = @transform_1, window_bounds = array<i64: 1, 8, 512>}, {transform_indices = @transform_2, window_bounds = array<i64: 1, 8, 512>}, {transform_indices = @transform_3, window_bounds = array<i64: 512, 128>}, {transform_indices = @transform_4, window_bounds = array<i64: 1, 128>}, {transform_indices = @transform_5, window_bounds = array<i64: 512, 128>}, {transform_indices = @transform_6, window_bounds = array<i64: 1, 128>}, {transform_indices = @transform_7, window_bounds = array<i64: 512, 128>}, {transform_indices = @transform_8, window_bounds = array<i64: 1, 128>}, {transform_indices = @transform_9, window_bounds = array<i64: 128, 512>}, {pipeline_mode = #tpu.pipeline_mode<synchronous>, transform_indices = @transform_10, window_bounds = array<i64: 1, 512>}, {transform_indices = @transform_11, window_bounds = array<i64: 1, 8, 512>}, {transform_indices = @transform_12, window_bounds = array<i64: 1, 2, 8, 8>}]} {
    %c0 = arith.constant 0 : index
    %c0_0 = arith.constant 0 : index
    %c0_1 = arith.constant 0 : index
    %0 = vector.load %arg3[%c0, %c0_0, %c0_1] : memref<1x8x512xbf16, #tpu.memory_space<vmem>>, vector<1x8x512xbf16>
    %1 = vector.shape_cast %0 : vector<1x8x512xbf16> to vector<8x512xbf16>
    %c0_2 = arith.constant 0 : index
    %c0_3 = arith.constant 0 : index
    %c0_4 = arith.constant 0 : index
    %2 = vector.load %arg4[%c0_2, %c0_3, %c0_4] : memref<1x8x512xbf16, #tpu.memory_space<vmem>>, vector<1x8x512xbf16>
    %3 = vector.shape_cast %2 : vector<1x8x512xbf16> to vector<8x512xbf16>
    %c0_5 = arith.constant 0 : index
    %c0_6 = arith.constant 0 : index
    %c0_7 = arith.constant 0 : index
    %4 = vector.load %arg5[%c0_5, %c0_6, %c0_7] : memref<1x8x512xbf16, #tpu.memory_space<vmem>>, vector<1x8x512xbf16>
    %5 = vector.shape_cast %4 : vector<1x8x512xbf16> to vector<8x512xbf16>
    %c0_8 = arith.constant 0 : index
    %c0_9 = arith.constant 0 : index
    %6 = vector.load %arg6[%c0_8, %c0_9] : memref<512x128xbf16, #tpu.memory_space<vmem>>, vector<512x128xbf16>
    %cst = arith.constant dense<0.000000e+00> : vector<8x128xf32>
    %7 = tpu.matmul %1, %6, %cst {dimension_numbers = #tpu.dot_dimension_numbers<[1], [0], [0], [1], [0, 0, 1, 1], [], []>} : vector<8x512xbf16>, vector<512x128xbf16>, vector<8x128xf32> -> vector<8x128xf32>
    %c0_10 = arith.constant 0 : index
    %c0_11 = arith.constant 0 : index
    %8 = vector.load %arg7[%c0_10, %c0_11] : memref<1x128xf32, #tpu.memory_space<vmem>>, vector<1x128xf32>
    %9 = vector.broadcast %8 : vector<1x128xf32> to vector<8x128xf32>
    %10 = arith.addf %7, %9 : vector<8x128xf32>
    %c0_12 = arith.constant 0 : index
    %c0_13 = arith.constant 0 : index
    %11 = vector.load %arg8[%c0_12, %c0_13] : memref<512x128xbf16, #tpu.memory_space<vmem>>, vector<512x128xbf16>
    %cst_14 = arith.constant dense<0.000000e+00> : vector<8x128xf32>
    %12 = tpu.matmul %3, %11, %cst_14 {dimension_numbers = #tpu.dot_dimension_numbers<[1], [0], [0], [1], [0, 0, 1, 1], [], []>} : vector<8x512xbf16>, vector<512x128xbf16>, vector<8x128xf32> -> vector<8x128xf32>
    %c0_15 = arith.constant 0 : index
    %c0_16 = arith.constant 0 : index
    %13 = vector.load %arg9[%c0_15, %c0_16] : memref<1x128xf32, #tpu.memory_space<vmem>>, vector<1x128xf32>
    %14 = vector.broadcast %13 : vector<1x128xf32> to vector<8x128xf32>
    %15 = arith.addf %12, %14 : vector<8x128xf32>
    %c0_17 = arith.constant 0 : index
    %c0_18 = arith.constant 0 : index
    %16 = vector.load %arg10[%c0_17, %c0_18] : memref<512x128xbf16, #tpu.memory_space<vmem>>, vector<512x128xbf16>
    %cst_19 = arith.constant dense<0.000000e+00> : vector<8x128xf32>
    %17 = tpu.matmul %5, %16, %cst_19 {dimension_numbers = #tpu.dot_dimension_numbers<[1], [0], [0], [1], [0, 0, 1, 1], [], []>} : vector<8x512xbf16>, vector<512x128xbf16>, vector<8x128xf32> -> vector<8x128xf32>
    %c0_20 = arith.constant 0 : index
    %c0_21 = arith.constant 0 : index
    %18 = vector.load %arg11[%c0_20, %c0_21] : memref<1x128xf32, #tpu.memory_space<vmem>>, vector<1x128xf32>
    %19 = vector.broadcast %18 : vector<1x128xf32> to vector<8x128xf32>
    %20 = arith.addf %17, %19 : vector<8x128xf32>
    %21 = vector.extract_strided_slice %10 {offsets = [0, 0], sizes = [8, 64], strides = [1, 1]} : vector<8x128xf32> to vector<8x64xf32>
    %22 = vector.extract_strided_slice %15 {offsets = [0, 0], sizes = [8, 64], strides = [1, 1]} : vector<8x128xf32> to vector<8x64xf32>
    %23 = vector.extract_strided_slice %20 {offsets = [0, 0], sizes = [8, 64], strides = [1, 1]} : vector<8x128xf32> to vector<8x64xf32>
    %24 = arith.truncf %21 : vector<8x64xf32> to vector<8x64xbf16>
    %25 = arith.truncf %22 : vector<8x64xf32> to vector<8x64xbf16>
    %cst_22 = arith.constant dense<0.000000e+00> : vector<8x8xf32>
    %26 = tpu.matmul %24, %25, %cst_22 {dimension_numbers = #tpu.dot_dimension_numbers<[1], [1], [0], [0], [0, 0, 1, 0], [], []>} : vector<8x64xbf16>, vector<8x64xbf16>, vector<8x8xf32> -> vector<8x8xf32>
    %cst_23 = arith.constant 1.250000e-01 : f32
    %27 = vector.broadcast %cst_23 : f32 to vector<8x8xf32>
    %28 = arith.mulf %26, %27 : vector<8x8xf32>
    %cst_24 = arith.constant dense<0xFF800000> : vector<8xf32>
    %29 = vector.multi_reduction <maximumf>, %28, %cst_24 [1] : vector<8x8xf32> to vector<8xf32>
    %30 = vector.shape_cast %29 : vector<8xf32> to vector<8x1xf32>
    %31 = vector.broadcast %30 : vector<8x1xf32> to vector<8x8xf32>
    %32 = arith.subf %28, %31 : vector<8x8xf32>
    %33 = math.exp %32 : vector<8x8xf32>
    %cst_25 = arith.constant dense<0.000000e+00> : vector<8xf32>
    %34 = vector.multi_reduction <add>, %33, %cst_25 [1] : vector<8x8xf32> to vector<8xf32>
    %35 = vector.shape_cast %34 : vector<8xf32> to vector<8x1xf32>
    %36 = tpu.reciprocal %35 : vector<8x1xf32> -> vector<8x1xf32>
    %37 = vector.broadcast %36 : vector<8x1xf32> to vector<8x8xf32>
    %38 = arith.mulf %33, %37 : vector<8x8xf32>
    %c0_26 = arith.constant 0 : index
    %c0_27 = arith.constant 0 : index
    %c0_28 = arith.constant 0 : index
    %c0_29 = arith.constant 0 : index
    %39 = vector.load %arg15[%c0_26, %c0_27, %c0_28, %c0_29] : memref<1x2x8x8xf32, #tpu.memory_space<vmem>>, vector<1x1x8x8xf32>
    %40 = vector.shape_cast %39 : vector<1x1x8x8xf32> to vector<8x8xf32>
    %41 = vector.shape_cast %38 : vector<8x8xf32> to vector<1x1x8x8xf32>
    tpu.vector_store %arg15[%c0_26, %c0_27, %c0_28, %c0_29], %41 {strides = array<i32>} : memref<1x2x8x8xf32, #tpu.memory_space<vmem>>, vector<1x1x8x8xf32>,
    %42 = arith.truncf %38 : vector<8x8xf32> to vector<8x8xbf16>
    %43 = arith.truncf %23 : vector<8x64xf32> to vector<8x64xbf16>
    %cst_30 = arith.constant dense<0.000000e+00> : vector<8x64xf32>
    %44 = tpu.matmul %42, %43, %cst_30 {dimension_numbers = #tpu.dot_dimension_numbers<[1], [0], [0], [1], [0, 0, 1, 1], [], []>} : vector<8x8xbf16>, vector<8x64xbf16>, vector<8x64xf32> -> vector<8x64xf32>
    %45 = vector.extract_strided_slice %10 {offsets = [0, 64], sizes = [8, 64], strides = [1, 1]} : vector<8x128xf32> to vector<8x64xf32>
    %46 = vector.extract_strided_slice %15 {offsets = [0, 64], sizes = [8, 64], strides = [1, 1]} : vector<8x128xf32> to vector<8x64xf32>
    %47 = vector.extract_strided_slice %20 {offsets = [0, 64], sizes = [8, 64], strides = [1, 1]} : vector<8x128xf32> to vector<8x64xf32>
    %48 = arith.truncf %45 : vector<8x64xf32> to vector<8x64xbf16>
    %49 = arith.truncf %46 : vector<8x64xf32> to vector<8x64xbf16>
    %cst_31 = arith.constant dense<0.000000e+00> : vector<8x8xf32>
    %50 = tpu.matmul %48, %49, %cst_31 {dimension_numbers = #tpu.dot_dimension_numbers<[1], [1], [0], [0], [0, 0, 1, 0], [], []>} : vector<8x64xbf16>, vector<8x64xbf16>, vector<8x8xf32> -> vector<8x8xf32>
    %cst_32 = arith.constant 1.250000e-01 : f32
    %51 = vector.broadcast %cst_32 : f32 to vector<8x8xf32>
    %52 = arith.mulf %50, %51 : vector<8x8xf32>
    %cst_33 = arith.constant dense<0xFF800000> : vector<8xf32>
    %53 = vector.multi_reduction <maximumf>, %52, %cst_33 [1] : vector<8x8xf32> to vector<8xf32>
    %54 = vector.shape_cast %53 : vector<8xf32> to vector<8x1xf32>
    %55 = vector.broadcast %54 : vector<8x1xf32> to vector<8x8xf32>
    %56 = arith.subf %52, %55 : vector<8x8xf32>
    %57 = math.exp %56 : vector<8x8xf32>
    %cst_34 = arith.constant dense<0.000000e+00> : vector<8xf32>
    %58 = vector.multi_reduction <add>, %57, %cst_34 [1] : vector<8x8xf32> to vector<8xf32>
    %59 = vector.shape_cast %58 : vector<8xf32> to vector<8x1xf32>
    %60 = tpu.reciprocal %59 : vector<8x1xf32> -> vector<8x1xf32>
    %61 = vector.broadcast %60 : vector<8x1xf32> to vector<8x8xf32>
    %62 = arith.mulf %57, %61 : vector<8x8xf32>
    %c0_35 = arith.constant 0 : index
    %c1 = arith.constant 1 : index
    %c0_36 = arith.constant 0 : index
    %c0_37 = arith.constant 0 : index
    %63 = vector.load %arg15[%c0_35, %c1, %c0_36, %c0_37] : memref<1x2x8x8xf32, #tpu.memory_space<vmem>>, vector<1x1x8x8xf32>
    %64 = vector.shape_cast %63 : vector<1x1x8x8xf32> to vector<8x8xf32>
    %65 = vector.shape_cast %62 : vector<8x8xf32> to vector<1x1x8x8xf32>
    tpu.vector_store %arg15[%c0_35, %c1, %c0_36, %c0_37], %65 {strides = array<i32>} : memref<1x2x8x8xf32, #tpu.memory_space<vmem>>, vector<1x1x8x8xf32>,
    %66 = arith.truncf %62 : vector<8x8xf32> to vector<8x8xbf16>
    %67 = arith.truncf %47 : vector<8x64xf32> to vector<8x64xbf16>
    %cst_38 = arith.constant dense<0.000000e+00> : vector<8x64xf32>
    %68 = tpu.matmul %66, %67, %cst_38 {dimension_numbers = #tpu.dot_dimension_numbers<[1], [0], [0], [1], [0, 0, 1, 1], [], []>} : vector<8x8xbf16>, vector<8x64xbf16>, vector<8x64xf32> -> vector<8x64xf32>
    %69 = tpu.concatenate %44, %68 in 1 : vector<8x64xf32>, vector<8x64xf32> -> vector<8x128xf32>
    %c0_i32 = arith.constant 0 : i32
    %70 = arith.cmpi eq, %arg2, %c0_i32 : i32
    %71 = arith.extui %70 : i1 to i32
    %c0_i32_39 = arith.constant 0 : i32
    %72 = arith.cmpi ne, %71, %c0_i32_39 : i32
    scf.if %72 {
      %c0_48 = arith.constant 0 : index
      %c0_49 = arith.constant 0 : index
      %82 = vector.load %arg13[%c0_48, %c0_49] : memref<1x512xf32, #tpu.memory_space<vmem>>, vector<1x512xf32>
      %83 = vector.shape_cast %82 : vector<1x512xf32> to vector<1x512xf32>
      %84 = vector.broadcast %83 : vector<1x512xf32> to vector<8x512xf32>
      %c0_50 = arith.constant 0 : index
      %c0_51 = arith.constant 0 : index
      %85 = vector.load %arg16[%c0_50, %c0_51] : memref<8x512xf32, #tpu.memory_space<vmem>>, vector<8x512xf32>
      tpu.vector_store %arg16[%c0_50, %c0_51], %84 {strides = array<i32>} : memref<8x512xf32, #tpu.memory_space<vmem>>, vector<8x512xf32>,
    } else {
    }
    %c0_40 = arith.constant 0 : index
    %c0_41 = arith.constant 0 : index
    %73 = vector.load %arg16[%c0_40, %c0_41] : memref<8x512xf32, #tpu.memory_space<vmem>>, vector<8x512xf32>
    %74 = arith.truncf %69 : vector<8x128xf32> to vector<8x128xbf16>
    %c0_42 = arith.constant 0 : index
    %c0_43 = arith.constant 0 : index
    %75 = vector.load %arg12[%c0_42, %c0_43] : memref<128x512xbf16, #tpu.memory_space<vmem>>, vector<128x512xbf16>
    %cst_44 = arith.constant dense<0.000000e+00> : vector<8x512xf32>
    %76 = tpu.matmul %74, %75, %cst_44 {dimension_numbers = #tpu.dot_dimension_numbers<[1], [0], [0], [1], [0, 0, 1, 1], [], []>} : vector<8x128xbf16>, vector<128x512xbf16>, vector<8x512xf32> -> vector<8x512xf32>
    %77 = arith.addf %73, %76 : vector<8x512xf32>
    %c0_45 = arith.constant 0 : index
    %c0_46 = arith.constant 0 : index
    %78 = vector.load %arg16[%c0_45, %c0_46] : memref<8x512xf32, #tpu.memory_space<vmem>>, vector<8x512xf32>
    tpu.vector_store %arg16[%c0_45, %c0_46], %77 {strides = array<i32>} : memref<8x512xf32, #tpu.memory_space<vmem>>, vector<8x512xf32>,
    %c3_i32 = arith.constant 3 : i32
    %79 = arith.cmpi eq, %arg2, %c3_i32 : i32
    %80 = arith.extui %79 : i1 to i32
    %c0_i32_47 = arith.constant 0 : i32
    %81 = arith.cmpi ne, %80, %c0_i32_47 : i32
    scf.if %81 {
      %c0_48 = arith.constant 0 : index
      %c0_49 = arith.constant 0 : index
      %82 = vector.load %arg16[%c0_48, %c0_49] : memref<8x512xf32, #tpu.memory_space<vmem>>, vector<8x512xf32>
      %c0_50 = arith.constant 0 : index
      %c0_51 = arith.constant 0 : index
      %c0_52 = arith.constant 0 : index
      %83 = vector.load %arg14[%c0_50, %c0_51, %c0_52] : memref<1x8x512xf32, #tpu.memory_space<vmem>>, vector<1x8x512xf32>
      %84 = vector.shape_cast %83 : vector<1x8x512xf32> to vector<8x512xf32>
      %85 = vector.shape_cast %82 : vector<8x512xf32> to vector<1x8x512xf32>
      tpu.vector_store %arg14[%c0_50, %c0_51, %c0_52], %85 {strides = array<i32>} : memref<1x8x512xf32, #tpu.memory_space<vmem>>, vector<1x8x512xf32>,
    } else {
    }
    return
  }
  func.func @transform_0(%arg0: i32, %arg1: i32, %arg2: i32) -> (i32, i32, i32) {
    %c0_i32 = arith.constant 0 : i32
    %c0_i32_0 = arith.constant 0 : i32
    return %arg0, %arg1, %c0_i32 : i32, i32, i32
  }
  func.func @transform_1(%arg0: i32, %arg1: i32, %arg2: i32) -> (i32, i32, i32) {
    %c0_i32 = arith.constant 0 : i32
    %c0_i32_0 = arith.constant 0 : i32
    %c0_i32_1 = arith.constant 0 : i32
    return %arg0, %c0_i32, %c0_i32_0 : i32, i32, i32
  }
  func.func @transform_2(%arg0: i32, %arg1: i32, %arg2: i32) -> (i32, i32, i32) {
    %c0_i32 = arith.constant 0 : i32
    %c0_i32_0 = arith.constant 0 : i32
    %c0_i32_1 = arith.constant 0 : i32
    return %arg0, %c0_i32, %c0_i32_0 : i32, i32, i32
  }
  func.func @transform_3(%arg0: i32, %arg1: i32, %arg2: i32) -> (i32, i32) {
    %c0_i32 = arith.constant 0 : i32
    %c0_i32_0 = arith.constant 0 : i32
    return %c0_i32, %arg2 : i32, i32
  }
  func.func @transform_4(%arg0: i32, %arg1: i32, %arg2: i32) -> (i32, i32) {
    %c0_i32 = arith.constant 0 : i32
    %c0_i32_0 = arith.constant 0 : i32
    return %c0_i32, %arg2 : i32, i32
  }
  func.func @transform_5(%arg0: i32, %arg1: i32, %arg2: i32) -> (i32, i32) {
    %c0_i32 = arith.constant 0 : i32
    %c0_i32_0 = arith.constant 0 : i32
    return %c0_i32, %arg2 : i32, i32
  }
  func.func @transform_6(%arg0: i32, %arg1: i32, %arg2: i32) -> (i32, i32) {
    %c0_i32 = arith.constant 0 : i32
    %c0_i32_0 = arith.constant 0 : i32
    return %c0_i32, %arg2 : i32, i32
  }
  func.func @transform_7(%arg0: i32, %arg1: i32, %arg2: i32) -> (i32, i32) {
    %c0_i32 = arith.constant 0 : i32
    %c0_i32_0 = arith.constant 0 : i32
    return %c0_i32, %arg2 : i32, i32
  }
  func.func @transform_8(%arg0: i32, %arg1: i32, %arg2: i32) -> (i32, i32) {
    %c0_i32 = arith.constant 0 : i32
    %c0_i32_0 = arith.constant 0 : i32
    return %c0_i32, %arg2 : i32, i32
  }
  func.func @transform_9(%arg0: i32, %arg1: i32, %arg2: i32) -> (i32, i32) {
    %c0_i32 = arith.constant 0 : i32
    %c0_i32_0 = arith.constant 0 : i32
    return %arg2, %c0_i32 : i32, i32
  }
  func.func @transform_10(%arg0: i32, %arg1: i32, %arg2: i32) -> (i32, i32) {
    %c0_i32 = arith.constant 0 : i32
    %c0_i32_0 = arith.constant 0 : i32
    %c0_i32_1 = arith.constant 0 : i32
    return %c0_i32, %c0_i32_0 : i32, i32
  }
  func.func @transform_11(%arg0: i32, %arg1: i32, %arg2: i32) -> (i32, i32, i32) {
    %c0_i32 = arith.constant 0 : i32
    %c0_i32_0 = arith.constant 0 : i32
    return %arg0, %arg1, %c0_i32 : i32, i32, i32
  }
  func.func @transform_12(%arg0: i32, %arg1: i32, %arg2: i32) -> (i32, i32, i32, i32) {
    %c0_i32 = arith.constant 0 : i32
    %c0_i32_0 = arith.constant 0 : i32
    return %arg0, %arg2, %arg1, %c0_i32 : i32, i32, i32, i32
  }
}

</mosaic_0001>

<bundles_post_ra>
// kernel: multi_head_attention.1
= control target key start
LH: loop header
LB: loop body
LE: loop exit
PB: predicated region body
PF: predicated region fallthrough
CT: control target
= control target key end

     0   :  { %s5079_s0 = inlined_call_operand.hbm [shape: bf16[2,8,512], index: 0, kind: input, shape index: {}]   ;;  %s5080_s1 = inlined_call_operand.hbm [shape: bf16[2,8,512], index: 1, kind: input, shape index: {}]   ;;  %s5081_s2 = inlined_call_operand.hbm [shape: bf16[2,8,512], index: 2, kind: input, shape index: {}]   ;;  %s5082_s3 = inlined_call_operand.hbm [shape: bf16[512,512], index: 3, kind: input, shape index: {}]   ;;  %s5083_s4 = inlined_call_operand.hbm [shape: f32[1,512], index: 4, kind: input, shape index: {}]   ;;  %s5084_s5 = inlined_call_operand.hbm [shape: bf16[512,512], index: 5, kind: input, shape index: {}]   ;;  %s5085_s6 = inlined_call_operand.hbm [shape: f32[1,512], index: 6, kind: input, shape index: {}]   ;;  %s5086_s7 = inlined_call_operand.hbm [shape: bf16[512,512], index: 7, kind: input, shape index: {}]   ;;  %s5087_s8 = inlined_call_operand.hbm [shape: f32[1,512], index: 8, kind: input, shape index: {}]   ;;  %s5088_s9 = inlined_call_operand.hbm [shape: bf16[512,512], index: 9, kind: input, shape index: {}]   ;;  %s5089_s10 = inlined_call_operand.hbm [shape: f32[1,512], index: 10, kind: input, shape index: {}]   ;;  %s5090_s11 = inlined_call_operand.hbm [shape: f32[2,8,512], index: 11, kind: output, shape index: {0}]   ;;  %s5091_s12 = inlined_call_operand.hbm [shape: f32[2,8,8,8], index: 12, kind: output, shape index: {1}]  }
   0x1   :  { %5140 = sst [smem:[#allocation57_spill]] %s5080_s1 }
   0x2   :  { %5141 = sst [smem:[#allocation58_spill]] %s5082_s3 }
   0x3   :  { %5142 = sst [smem:[#allocation59_spill]] %s5084_s5 }
   0x4   :  { %5143 = sst [smem:[#allocation60_spill]] %s5087_s8 }
   0x5   :  { %5144 = sst [smem:[#allocation61_spill]] %s5088_s9 }
   0x6   :  { %5145 = sst [smem:[#allocation62_spill]] %s5089_s10 }
   0x7   :  { %5146 = sst [smem:[#allocation63_spill]] %s5090_s11 }
   0x8   :  { %5147 = sst [smem:[#allocation64_spill]] %s5091_s12 }
   0x9   :  { %18 = vsyncpa [#allocation4], 0 }
   0xa   :  { %20 = vsyncpa [#allocation4 + $0x1], 0 }
   0xb   :  { %21 = vsyncpa [#allocation7], 0 }
   0xc   :  { %23 = vsyncpa [#allocation7 + $0x1], 0 }
   0xd   :  { %24 = vsyncpa [#allocation10], 0 }
   0xe   :  { %26 = vsyncpa [#allocation10 + $0x1], 0 }
   0xf   :  { %27 = vsyncpa [#allocation13], 0 }
  0x10   :  { %29 = vsyncpa [#allocation13 + $0x1], 0 }
  0x11   :  { %30 = vsyncpa [#allocation16], 0 }
  0x12   :  { %32 = vsyncpa [#allocation16 + $0x1], 0 }
  0x13   :  { %33 = vsyncpa [#allocation19], 0 }
  0x14   :  { %35 = vsyncpa [#allocation19 + $0x1], 0 }
  0x15   :  { %36 = vsyncpa [#allocation5], 0 }
  0x16   :  { %38 = vsyncpa [#allocation5 + $0x1], 0 }
  0x17   :  { %39 = vsyncpa [#allocation23], 0 }
  0x18   :  { %41 = vsyncpa [#allocation23 + $0x1], 0  ;;  %s4158_s21 = smov 0   ;;  %s4160_s22 = smov 0  }
  0x19   :  { %s4162_s23 = smov 0   ;;  %s4164_s24 = smov 0  }
  0x1a   :  { %s4166_s25 = smov 0   ;;  %s4168_s26 = smov 0  }
  0x1b   :  { %s4170_s27 = smov 0   ;;  %s4172_s28 = smov 0  }
  0x1c   :  { %s4174_s29 = smov 0   ;;  %s4176_s30 = smov 0  }
  0x1d   :  { %s4178_s13 = smov 0   ;;  %s4180_s14 = smov 0  }
  0x1e   :  { %s4182_s15 = smov 0   ;;  %s4184_s16 = smov 0  }
  0x1f LB: > { %5148 = sst [smem:[#allocation33_spill]] %s4016_s21  ;;  %s4227_s17 = sadd.s32 4294967295, %s4068_s16   ;;  %s4068_s16 = sphi %s4184_s16, %s47_s16   ;;  %s4064_s15 = sphi %s4182_s15, %s5258_s15   ;;  %s4060_s14 = sphi %s4180_s14, %s5257_s14   ;;  %s4056_s13 = sphi %s4178_s13, %s5249_s13   ;;  %s4052_s30 = sphi %s4176_s30, %s5256_s30   ;;  %s4048_s29 = sphi %s4174_s29, %s5255_s29   ;;  %s4044_s28 = sphi %s4172_s28, %s5254_s28   ;;  %s4040_s27 = sphi %s4170_s27, %s5247_s27   ;;  %s4036_s26 = sphi %s4168_s26, %s5246_s26   ;;  %s4032_s25 = sphi %s4166_s25, %s5245_s25   ;;  %s4028_s24 = sphi %s4164_s24, %s5244_s24   ;;  %s4024_s23 = sphi %s4162_s23, %s5243_s23   ;;  %s4020_s22 = sphi %s4160_s22, %s5253_s22   ;;  %s4016_s21 = sphi %s4158_s21, %s5241_s21  }
  0x20   : > { %5149 = sst [smem:[#allocation34_spill]] %s4020_s22  ;;  %s2811_s18 = sadd.s32 4294967294, %s4068_s16  }
  0x21   : > { %5150 = sst [smem:[#allocation35_spill]] %s4024_s23  ;;  %p88_p0 = scmp.ne.s32.totalorder %s4044_s28, %s4040_s27 }
  0x22   : > { %5151 = sst [smem:[#allocation36_spill]] %s4032_s25  ;;  %p5105_p1 = scmp.eq.s32.totalorder %s4227_s17, 0 }
  0x23   : > { %5152 = sst [smem:[#allocation37_spill]] %s4036_s26  ;;  %p166_p4 = scmp.ne.s32.totalorder %s4032_s25, %s4028_s24 }
  0x24   : > { %5153 = sst [smem:[#allocation38_spill]] %s4040_s27  ;;  %p4238_p3 = por %p5105_p1, %p88_p0 }
  0x25   : > { %5154 = sst [smem:[#allocation39_spill]] %s4044_s28  ;;  %p5108_p5 = scmp.eq.s32.totalorder %s4227_s17, 7 }
  0x26   : > { %5155 = sst [smem:[#allocation40_spill]] %s4052_s30  ;;  %p375_p6 = scmp.eq.s32.totalorder %s2811_s18, 7 }
  0x27   : > { %5156 = sst [smem:[#allocation41_spill]] %s4056_s13  ;;  %p4246_p7 = por %p166_p4, %p5105_p1 }
  0x28   : > { %5157 = sst [smem:[#allocation42_spill]] %s4064_s15  ;;  %p4251_p8 = por %p375_p6, %p88_p0 }
  0x29   : > { %5158 = sst [smem:[#allocation43_spill]] %s4068_s16  ;;  %p398_p9 = scmp.ne.s32.totalorder %s4024_s23, %s4020_s22 }
  0x2a   : > { %5159 = sst [smem:[#allocation44_spill]] %s4227_s17  ;;  %p404_p10 = scmp.ne.s32.totalorder %s4020_s22, %s4016_s21 }
  0x2b   : > { %s5160_s20 = scalar_select %p4238_p3, 1, 0 }
  0x2c   : > { %s5162_s12 = scalar_select %p4246_p7, 1, 0 }
  0x2d   : > { %5161 = sst [smem:[#allocation45_spill]] %s5160_s20  ;;  %p2812_p11 = scmp.ge.s32.totalorder %s4068_s16, 1 }
  0x2e   : > { %5163 = sst [smem:[#allocation46_spill]] %s5162_s12  ;;  %p4262_p12 = por %p398_p9, %p5108_p5 }
  0x2f   : > { %s5164_s27 = scalar_select %p4251_p8, 1, 0 }
  0x30   : > { %s5166_s19 = scalar_select %p4262_p12, 1, 0 }
  0x31   : > { %5165 = sst [smem:[#allocation47_spill]] %s5164_s27  ;;  %p412_p13 = scmp.lt.s32.totalorder %s4068_s16, 9 }
  0x32   : > { %5167 = sst [smem:[#allocation48_spill]] %s5166_s19  ;;  %p4267_p2 = por %p404_p10, %p375_p6 }
  0x33   : > { %p4271_p4 = pnand %p2812_p11, %p412_p13  ;;  %s4070_s11 = smov [#allocation20]  }
  0x34   : > { %s5168_s24 = scalar_select %p4267_p2, 1, 0 }
  0x35   : > { %s5170_s18 = scalar_select %p4271_p4, 1, 0 }
  0x36   : > { %5169 = sst [smem:[#allocation49_spill]] %s5168_s24  ;;  %s425_s27 = sshll.u32 %s4070_s11, 4  ;;  %s426_s27 = int_to_ptr.vmem [resolvable:$true] %s425_s27 }
  0x37   : > { %5171 = sst [smem:[#allocation50_spill]] %s5170_s18  ;;  %p3205_p0 = pneg %p4271_p4 }
  0x38   : > { %s5173_s10 = sld [smem:[#allocation62_spill]] }
  0x39   : > { %p4279_p9 = pnand %p3205_p0, %p5105_p1 }
  0x3b   : > { %p3540_p10 = pneg %p4279_p9 }
  0x3e   : > { %s3538_s24 = scalar_lea.hbm %s5173_s10, 64 }
  0x3f   : > { %p3539_p6 = scmp.ne.s32.totalorder %s5173_s10, %s3538_s24  ;;  %p3545_p0 = scmp.lt.u32.totalorder %s3538_s24, %s5173_s10 }
  0x41   : > { %p3541_p11 = pnand %p3540_p10, %p3539_p6 }
  0x43   : > { %p3542_p13 = pneg %p3541_p11 }
  0x45   : > { %p3547_p1 = pnand %p3545_p0, %p3542_p13 }
  0x47   : > { %3550 = shalt.err (!%p3547_p1)
}
  0x48   : > { %s3551_s20 = scalar_lea.vmem %s426_s27, 64  ;;  %p3559_p12 = scmp.lt.s32.totalorder %s426_s27, %s426_s27 }
  0x49   : > { %p3552_p5 = scmp.ne.s32.totalorder %s426_s27, %s3551_s20  ;;  %p3560_p7 = scmp.lt.s32.totalorder %s3551_s20, %s3551_s20 }
  0x4b   : > { %p3554_p2 = pnand %p3552_p5, %p3540_p10  ;;  %p3561_p3 = por %p3560_p7, %p3559_p12 }
  0x4d   : > { %p3555_p8 = pneg %p3554_p2 }
  0x4f   : > { %p3562_p4 = pnand %p3561_p3, %p3555_p8 }
  0x51   : > { %3565 = shalt.err (!%p3562_p4)
}
  0x52   : > { %3208 = dma.hbm_to_vmem [thread:$0]  (!%p4279_p9), %s5173_s10, 64, %s426_s27, [#allocation19]  }
  0x53   : > { %s59_s12 = sadd.s32 1, %s4060_s14  ;;  %s66_s21 = sadd.s32 1, %s4064_s15 }
  0x54   : > { %p60_p1 = scmp.ge.s32.totalorder %s59_s12, 4  ;;  %s75_s13 = sadd.s32 1, %s4048_s29 }
  0x55   : > { %p82_p2 = scmp.ne.s32.totalorder %s4048_s29, %s4044_s28  ;;  %p83_p3 = scmp.eq.s32.totalorder %s4068_s16, 0 }
  0x56   : > { %s5260_s12 = smov (%p60_p1, %s59_s12), 0  ;;  %s5262_s21 = smov (!%p60_p1, %s66_s21), %s4064_s15 }
  0x57   : > { %5174 = sst [smem:[#allocation51_spill]] %s5260_s12  ;;  %p4308_p5 = por %p83_p3, %p82_p2 }
  0x58   : > { %s150_s19 = ssub.s32 %s4060_s14, %s5260_s12  ;;  %p68_p7 = scmp.ge.s32.totalorder %s5262_s21, 2 }
  0x59   : > { %p151_p8 = scmp.eq.s32.totalorder %s150_s19, 0  ;;  %p5176_p12 = scmp.ne.s32.totalorder %s4036_s26, %s4032_s25 }
  0x5a   : > { %p5178_p9 = scmp.eq.s32.totalorder %s4227_s17, 7  ;;  %s5264_s21 = smov (%p68_p7, %s5262_s21), 0 }
  0x5b   : > { %p4317_p4 = por %p5176_p12, %p83_p3  ;;  %5181 = sst [smem:[#allocation53_spill]] %s5264_s21 }
  0x5c   : > { %p4323_p6 = por %p5178_p9, %p82_p2  ;;  %s5182_s11 = sadd.s32 1, %s4036_s26 }
  0x5d   : > { %s4332_s22 = scalar_select %p151_p8, %s4036_s26, %s5182_s11  }
  0x5e   : > { %s5179_s24 = scalar_select %p4323_p6, 1, 0 }
  0x5f   : > { %5183 = sst [smem:[#allocation54_spill]] %s4332_s22  ;;  %s70_s30 = ssub.s32 %s4064_s15, %s5264_s21 }
  0x60   : > { %5180 = sst [smem:[#allocation52_spill]] %s5179_s24  ;;  %p3248_p10 = scmp.lt.s32.totalorder %s4068_s16, 8 }
  0x61   : > { %p73_p11 = scmp.eq.s32.totalorder %s70_s30, 0  ;;  %s383_s10 = sor.u32 %s150_s19, %s70_s30 }
  0x62   : > { %p386_p13 = scmp.eq.s32.totalorder %s383_s10, 0  ;;  %s5121_s12 = sand.u32 1, %s4048_s29  }
  0x63   : > { %s4339_s25 = scalar_select %p73_p11, %s4048_s29, %s75_s13  }
  0x64   : > { %s5185_s17 = sadd.s32 1, %s4024_s23  ;;  %s4348_s24 = sshll.u32 %s5121_s12, 4 }
  0x65   : > { %5184 = sst [smem:[#allocation55_spill]] %s4339_s25  ;;  %s4351_s18 = sshll.u32 %s4064_s15, 8 }
  0x66   : > { %s4344_s28 = scalar_select %p386_p13, %s4024_s23, %s5185_s17  }
  0x67   : > { %p4357_p0 = pnand %p3248_p10, %p4308_p5  ;;  %s4362_s10 = sand.u32 1, %s4068_s16  }
  0x68   : > { %5186 = sst [smem:[#allocation56_spill]] %s4344_s28  ;;  %s5188_s1 = sld [smem:[#allocation57_spill]] }
  0x69   : > { %s5187_s11 = scalar_select %p4357_p0, 1, 0 }
  0x6a   : > { %s461_s27 = scalar_lea.vmem [#allocation6], %s4348_s24  ;;  %p4375_p1 = pnand %p3248_p10, %p4317_p4 }
  0x6b   : > { %s469_s30 = sshll.u32 %s461_s27, 4  ;;  %p4386_p3 = pneg %p4357_p0  ;;  %s4379_s30 = int_to_ptr.vmem [resolvable:$true] %s469_s30 }
  0x6c   : > { %s5189_s12 = scalar_select %p4375_p1, 1, 0 }
  0x6d   : > { %s5190_s13 = scalar_select %p4386_p3, 1, 0 }
  0x6e   : > { %s4368_s17 = scalar_lea.hbm %s5188_s1, %s4351_s18  ;;  %s3571_s27 = scalar_lea.hbm %s5188_s1, 512 }
  0x6f   : > { %s3566_s15 = scalar_lea.hbm %s4368_s17, 256  ;;  %p3572_p8 = scmp.lt.u32.totalorder %s4368_s17, %s5188_s1 }
  0x70   : > { %p3567_p2 = scmp.ne.s32.totalorder %s4368_s17, %s3566_s15  ;;  %p3573_p12 = scmp.lt.u32.totalorder %s3571_s27, %s3566_s15 }
  0x71   : > { %p3575_p9 = scmp.lt.u32.totalorder %s3566_s15, %s4368_s17 }
  0x72   : > { %p3569_p5 = pnand %p4386_p3, %p3567_p2  ;;  %p3574_p4 = por %p3573_p12, %p3572_p8 }
  0x74   : > { %p3570_p7 = pneg %p3569_p5  ;;  %p3576_p10 = por %p3575_p9, %p3574_p4 }
  0x76   : > { %p3577_p11 = pnand %p3576_p10, %p3570_p7 }
  0x78   : > { %3580 = shalt.err (!%p3577_p11)
}
  0x79   : > { %s3581_s21 = scalar_lea.vmem %s4379_s30, 256  ;;  %s4071_s20 = smov [#allocation6]  }
  0x7a   : > { %p3582_p13 = scmp.ne.s32.totalorder %s4379_s30, %s3581_s21  ;;  %s3586_s19 = sshll.u32 %s4071_s20, 4  ;;  %s3587_s19 = int_to_ptr.vmem [resolvable:$false] %s3586_s19 }
  0x7b   : > { %s3588_s25 = scalar_lea.vmem %s3587_s19, 512  ;;  %p3589_p6 = scmp.lt.s32.totalorder %s4379_s30, %s3587_s19 }
  0x7c   : > { %p3584_p2 = pnand %p3582_p13, %p4386_p3  ;;  %p3590_p1 = scmp.lt.s32.totalorder %s3588_s25, %s3581_s21 }
  0x7e   : > { %p3585_p5 = pneg %p3584_p2  ;;  %p3591_p8 = por %p3590_p1, %p3589_p6 }
  0x80   : > { %p3592_p12 = pnand %p3591_p8, %p3585_p5 }
  0x82   : > { %3595 = shalt.err (!%p3592_p12)
}
  0x83   : > { %s5191_s15 = scalar_lea.sflag [#allocation7], %s4362_s10  ;;  %s4412_s22 = sand.u32 1, %s4036_s26  }
  0x84   : > { %3215 = dma.hbm_to_vmem [thread:$0]  (!%p4357_p0), %s4368_s17, 256, %s4379_s30, %s5191_s15  }
  0x85   : > { %s4415_s27 = sshll.u32 %s4412_s22, 8  ;;  %s4418_s21 = sshll.u32 %s4060_s14, 6 }
  0x86   : > { %s5192_s3 = sld [smem:[#allocation58_spill]]  ;;  %s499_s1 = scalar_lea.vmem [#allocation9], %s4415_s27 }
  0x87   : > { %s505_s17 = sshll.u32 %s499_s1, 4  ;;  %p5193_p1 = scmp.ne.s32.totalorder %s5189_s12, 0  ;;  %s4427_s17 = int_to_ptr.vmem [resolvable:$true] %s505_s17 }
  0x89   : > { %p4434_p7 = pneg %p5193_p1 }
  0x8b   : > { %s5194_s26 = scalar_select %p4434_p7, 1, 0 }
  0x8c   : > { %s4424_s25 = scalar_lea.hbm %s5192_s3, %s4418_s21  ;;  %s3601_s28 = scalar_lea.hbm %s5192_s3, 16384 }
  0x8d   : > { %s3596_s15 = scalar_lea.hbm %s4424_s25, 4096  ;;  %p3602_p10 = scmp.lt.u32.totalorder %s4424_s25, %s5192_s3 }
  0x8e   : > { %p3597_p6 = scmp.ne.s32.totalorder %s4424_s25, %s3596_s15  ;;  %p3603_p11 = scmp.lt.u32.totalorder %s3601_s28, %s3596_s15 }
  0x8f   : > { %p3605_p2 = scmp.lt.u32.totalorder %s3596_s15, %s4424_s25 }
  0x90   : > { %p3599_p4 = pnand %p4434_p7, %p3597_p6  ;;  %p3604_p13 = por %p3603_p11, %p3602_p10 }
  0x92   : > { %p3600_p9 = pneg %p3599_p4  ;;  %p3606_p5 = por %p3605_p2, %p3604_p13 }
  0x94   : > { %p3607_p8 = pnand %p3606_p5, %p3600_p9 }
  0x96   : > { %3610 = shalt.err (!%p3607_p8)
}
  0x97   : > { %s3611_s30 = scalar_lea.vmem %s4427_s17, 4096  ;;  %s4072_s20 = smov [#allocation9]  }
  0x98   : > { %p3612_p12 = scmp.ne.s32.totalorder %s4427_s17, %s3611_s30  ;;  %s3616_s19 = sshll.u32 %s4072_s20, 4  ;;  %s3617_s19 = int_to_ptr.vmem [resolvable:$false] %s3616_s19 }
  0x99   : > { %s3618_s23 = scalar_lea.vmem %s3617_s19, 8192  ;;  %p3619_p0 = scmp.lt.s32.totalorder %s4427_s17, %s3617_s19 }
  0x9a   : > { %p3614_p6 = pnand %p3612_p12, %p4434_p7  ;;  %p3620_p3 = scmp.lt.s32.totalorder %s3618_s23, %s3611_s30 }
  0x9c   : > { %p3615_p4 = pneg %p3614_p6  ;;  %p3621_p10 = por %p3620_p3, %p3619_p0 }
  0x9e   : > { %p3622_p11 = pnand %p3621_p10, %p3615_p4 }
  0xa0   : > { %3625 = shalt.err (!%p3622_p11)
}
  0xa1   : > { %s4073_s28 = smov 256   ;;  %s4074_s15 = smov 64  }
  0xa2   : > { %s4075_s1 = smov 4   ;;  %s5195_s20 = scalar_lea.sflag [#allocation10], %s4362_s10 }
  0xa3   : > { %3221 = dma.hbm_to_vmem [thread:$0]  (!%p5193_p1), %s4424_s25, 4096, %s4427_s17, %s5195_s20, %s4073_s28, %s4074_s15, %s4075_s1  }
  0xa4   : > { %s5196_s5 = sld [smem:[#allocation59_spill]]  ;;  %s536_s3 = scalar_lea.vmem [#allocation12], %s4415_s27 }
  0xa5   : > { %s542_s16 = sshll.u32 %s536_s3, 4  ;;  %s5136_s9 = scalar_lea.sflag [#allocation13], %s4362_s10  ;;  %s4469_s16 = int_to_ptr.vmem [resolvable:$true] %s542_s16 }
  0xaa   : > { %s4466_s23 = scalar_lea.hbm %s5196_s5, %s4418_s21  ;;  %s3631_s20 = scalar_lea.hbm %s5196_s5, 16384 }
  0xab   : > { %s3626_s8 = scalar_lea.hbm %s4466_s23, 4096  ;;  %p3632_p13 = scmp.lt.u32.totalorder %s4466_s23, %s5196_s5 }
  0xac   : > { %p3627_p0 = scmp.ne.s32.totalorder %s4466_s23, %s3626_s8  ;;  %p3633_p2 = scmp.lt.u32.totalorder %s3631_s20, %s3626_s8 }
  0xad   : > { %p3635_p8 = scmp.lt.u32.totalorder %s3626_s8, %s4466_s23 }
  0xae   : > { %p3629_p3 = pnand %p3627_p0, %p4434_p7  ;;  %p3634_p5 = por %p3633_p2, %p3632_p13 }
  0xb0   : > { %p3630_p9 = pneg %p3629_p3  ;;  %p3636_p12 = por %p3635_p8, %p3634_p5 }
  0xb2   : > { %p3637_p6 = pnand %p3636_p12, %p3630_p9 }
  0xb4   : > { %3640 = shalt.err (!%p3637_p6)
}
  0xb5   : > { %s3641_s3 = scalar_lea.vmem %s4469_s16, 4096  ;;  %s4076_s25 = smov [#allocation12]  }
  0xb6   : > { %p3642_p4 = scmp.ne.s32.totalorder %s4469_s16, %s3641_s3  ;;  %s3646_s17 = sshll.u32 %s4076_s25, 4  ;;  %s3647_s17 = int_to_ptr.vmem [resolvable:$false] %s3646_s17 }
  0xb7   : > { %s3648_s30 = scalar_lea.vmem %s3647_s17, 8192  ;;  %p3649_p0 = scmp.lt.s32.totalorder %s4469_s16, %s3647_s17 }
  0xb8   : > { %p3644_p10 = pnand %p3642_p4, %p4434_p7  ;;  %p3650_p3 = scmp.lt.s32.totalorder %s3648_s30, %s3641_s3 }
  0xba   : > { %p3645_p11 = pneg %p3644_p10  ;;  %p3651_p13 = por %p3650_p3, %p3649_p0 }
  0xbc   : > { %p3652_p2 = pnand %p3651_p13, %p3645_p11 }
  0xbe   : > { %3655 = shalt.err (!%p3652_p2)
}
  0xbf   : > { %3227 = dma.hbm_to_vmem [thread:$0]  (!%p5193_p1), %s4466_s23, 4096, %s4469_s16, %s5136_s9, %s4073_s28, %s4074_s15, %s4075_s1  }
  0xc0   : > { %s4502_s19 = scalar_lea.hbm %s5086_s7, %s4418_s21  ;;  %s573_s3 = scalar_lea.vmem [#allocation15], %s4415_s27 }
  0xc1   : > { %s579_s25 = sshll.u32 %s573_s3, 4  ;;  %s570_s17 = scalar_lea.sflag [#allocation16], %s4362_s10  ;;  %s4505_s25 = int_to_ptr.vmem [resolvable:$true] %s579_s25 }
  0xc2   : > { %s3656_s30 = scalar_lea.hbm %s4502_s19, 4096  ;;  %s3661_s8 = scalar_lea.hbm %s5086_s7, 16384 }
  0xc3   : > { %p3657_p9 = scmp.ne.s32.totalorder %s4502_s19, %s3656_s30  ;;  %p3662_p12 = scmp.lt.u32.totalorder %s4502_s19, %s5086_s7 }
  0xc4   : > { %p3663_p6 = scmp.lt.u32.totalorder %s3661_s8, %s3656_s30  ;;  %p3665_p10 = scmp.lt.u32.totalorder %s3656_s30, %s4502_s19 }
  0xc5   : > { %p3659_p5 = pnand %p3657_p9, %p4434_p7 }
  0xc6   : > { %p3664_p4 = por %p3663_p6, %p3662_p12 }
  0xc7   : > { %p3660_p8 = pneg %p3659_p5 }
  0xc8   : > { %p3666_p11 = por %p3665_p10, %p3664_p4 }
  0xca   : > { %p3667_p0 = pnand %p3666_p11, %p3660_p8 }
  0xcc   : > { %3670 = shalt.err (!%p3667_p0)
}
  0xcd   : > { %s3671_s3 = scalar_lea.vmem %s4505_s25, 4096  ;;  %s4077_s16 = smov [#allocation15]  }
  0xce   : > { %p3672_p3 = scmp.ne.s32.totalorder %s4505_s25, %s3671_s3  ;;  %s3676_s23 = sshll.u32 %s4077_s16, 4  ;;  %s3677_s23 = int_to_ptr.vmem [resolvable:$false] %s3676_s23 }
  0xcf   : > { %s3678_s21 = scalar_lea.vmem %s3677_s23, 8192  ;;  %p3679_p9 = scmp.lt.s32.totalorder %s4505_s25, %s3677_s23 }
  0xd0   : > { %p3674_p13 = pnand %p3672_p3, %p4434_p7  ;;  %p3680_p5 = scmp.lt.s32.totalorder %s3678_s21, %s3671_s3 }
  0xd2   : > { %p3675_p2 = pneg %p3674_p13  ;;  %p3681_p12 = por %p3680_p5, %p3679_p9 }
  0xd4   : > { %p3682_p6 = pnand %p3681_p12, %p3675_p2 }
  0xd6   : > { %3685 = shalt.err (!%p3682_p6)
}
  0xd7   : > { %3233 = dma.hbm_to_vmem [thread:$0]  (!%p5193_p1), %s4502_s19, 4096, %s4505_s25, %s570_s17, %s4073_s28, %s4074_s15, %s4075_s1  }
  0xd8   : > { %s4538_s20 = scalar_lea.hbm %s5079_s0, %s4351_s18  ;;  %s440_s3 = scalar_lea.vmem [#allocation3], %s4348_s24 }
  0xd9   : > { %s450_s16 = sshll.u32 %s440_s3, 4  ;;  %s4547_s9 = scalar_lea.hbm %s5081_s2, %s4351_s18  ;;  %s4541_s16 = int_to_ptr.vmem [resolvable:$true] %s450_s16 }
  0xda   : > { %s5197_s5 = sand.u32 1, %s4048_s29   ;;  %s3686_s1 = scalar_lea.hbm %s4538_s20, 256 }
  0xdb   : > { %s437_s15 = scalar_lea.sflag [#allocation4], %s5197_s5  ;;  %p3687_p8 = scmp.ne.s32.totalorder %s4538_s20, %s3686_s1 }
  0xdc   : > { %p5198_p4 = scmp.ne.s32.totalorder %s5190_s13, 0  ;;  %s3691_s30 = scalar_lea.hbm %s5079_s0, 512 }
  0xdd   : > { %p3692_p0 = scmp.lt.u32.totalorder %s4538_s20, %s5079_s0  ;;  %p3693_p3 = scmp.lt.u32.totalorder %s3691_s30, %s3686_s1 }
  0xde   : > { %p3689_p10 = pnand %p3687_p8, %p5198_p4  ;;  %p3695_p2 = scmp.lt.u32.totalorder %s3686_s1, %s4538_s20 }
  0xdf   : > { %p3694_p13 = por %p3693_p3, %p3692_p0 }
  0xe0   : > { %p3690_p11 = pneg %p3689_p10 }
  0xe1   : > { %p3696_p9 = por %p3695_p2, %p3694_p13 }
  0xe3   : > { %p3697_p5 = pnand %p3696_p9, %p3690_p11 }
  0xe5   : > { %3700 = shalt.err (!%p3697_p5)
}
  0xe6   : > { %s3701_s5 = scalar_lea.vmem %s4541_s16, 256  ;;  %s4078_s18 = smov [#allocation3]  }
  0xe7   : > { %p3702_p12 = scmp.ne.s32.totalorder %s4541_s16, %s3701_s5  ;;  %s3706_s23 = sshll.u32 %s4078_s18, 4  ;;  %s3707_s23 = int_to_ptr.vmem [resolvable:$false] %s3706_s23 }
  0xe8   : > { %s3708_s21 = scalar_lea.vmem %s3707_s23, 512  ;;  %p3709_p10 = scmp.lt.s32.totalorder %s4541_s16, %s3707_s23 }
  0xe9   : > { %p3704_p6 = pnand %p3702_p12, %p5198_p4  ;;  %p3710_p1 = scmp.lt.s32.totalorder %s3708_s21, %s3701_s5 }
  0xeb   : > { %p3705_p8 = pneg %p3704_p6  ;;  %p3711_p0 = por %p3710_p1, %p3709_p10 }
  0xed   : > { %p3712_p3 = pnand %p3711_p0, %p3705_p8 }
  0xef   : > { %3715 = shalt.err (!%p3712_p3)
}
  0xf0   : > { %p5199_p11 = scmp.ne.s32.totalorder %s5187_s11, 0  ;;  %s480_s1 = scalar_lea.vmem [#allocation8], %s4348_s24 }
  0xf1   : > { %s488_s19 = sshll.u32 %s480_s1, 4  ;;  %s4574_s25 = sshll.u32 %s4060_s14, 4  ;;  %s489_s19 = int_to_ptr.vmem [resolvable:$true] %s488_s19 }
  0xf2   : > { %3212 = dma.hbm_to_vmem [thread:$0]  (!%p5199_p11), %s4538_s20, 256, %s4541_s16, %s437_s15  }
  0xf3   : > { %s3716_s30 = scalar_lea.hbm %s4547_s9, 256  ;;  %s3721_s5 = scalar_lea.hbm %s5081_s2, 512 }
  0xf4   : > { %p3717_p1 = scmp.ne.s32.totalorder %s4547_s9, %s3716_s30  ;;  %p3722_p9 = scmp.lt.u32.totalorder %s4547_s9, %s5081_s2 }
  0xf5   : > { %p3723_p5 = scmp.lt.u32.totalorder %s3721_s5, %s3716_s30  ;;  %p3725_p6 = scmp.lt.u32.totalorder %s3716_s30, %s4547_s9 }
  0xf6   : > { %p3719_p13 = pnand %p3717_p1, %p5198_p4 }
  0xf7   : > { %p3724_p12 = por %p3723_p5, %p3722_p9 }
  0xf8   : > { %p3720_p2 = pneg %p3719_p13 }
  0xf9   : > { %p3726_p8 = por %p3725_p6, %p3724_p12 }
  0xfb   : > { %p3727_p10 = pnand %p3726_p8, %p3720_p2 }
  0xfd   : > { %3730 = shalt.err (!%p3727_p10)
}
  0xfe   : > { %s3731_s24 = scalar_lea.vmem %s489_s19, 256  ;;  %s4079_s20 = smov [#allocation8]  }
  0xff   : > { %p3732_p0 = scmp.ne.s32.totalorder %s489_s19, %s3731_s24  ;;  %s3736_s16 = sshll.u32 %s4079_s20, 4  ;;  %s3737_s16 = int_to_ptr.vmem [resolvable:$false] %s3736_s16 }
 0x100   : > { %s3738_s15 = scalar_lea.vmem %s3737_s16, 512  ;;  %p3739_p13 = scmp.lt.s32.totalorder %s489_s19, %s3737_s16 }
 0x101   : > { %p3734_p3 = pnand %p3732_p0, %p5198_p4  ;;  %p3740_p7 = scmp.lt.s32.totalorder %s3738_s15, %s3731_s24 }
 0x103   : > { %p3735_p1 = pneg %p3734_p3  ;;  %p3741_p11 = por %p3740_p7, %p3739_p13 }
 0x105   : > { %p3742_p5 = pnand %p3741_p11, %p3735_p1 }
 0x107   : > { %3745 = shalt.err (!%p3742_p5)
}
 0x108   : > { %p5200_p9 = scmp.ne.s32.totalorder %s5187_s11, 0  ;;  %s5201_s21 = scalar_lea.sflag [#allocation7], %s4362_s10 }
 0x109   : > { %s4599_s30 = scalar_lea.hbm %s5083_s4, %s4574_s25  ;;  %s518_s8 = scalar_lea.vmem [#allocation11], %s4412_s22 }
 0x10a   : > { %3218 = dma.hbm_to_vmem [thread:$0]  (!%p5200_p9), %s4547_s9, 256, %s489_s19, %s5201_s21  }
 0x10b   : > { %s525_s3 = sshll.u32 %s518_s8, 4  ;;  %s3746_s11 = scalar_lea.hbm %s4599_s30, 16  ;;  %s526_s3 = int_to_ptr.vmem [resolvable:$true] %s525_s3 }
 0x10c   : > { %p3747_p7 = scmp.ne.s32.totalorder %s4599_s30, %s3746_s11  ;;  %p5202_p4 = scmp.ne.s32.totalorder %s5194_s26, 0 }
 0x10d   : > { %s3751_s9 = scalar_lea.hbm %s5083_s4, 64  ;;  %p3752_p12 = scmp.lt.u32.totalorder %s4599_s30, %s5083_s4 }
 0x10e   : > { %p3749_p11 = pnand %p3747_p7, %p5202_p4  ;;  %p3753_p6 = scmp.lt.u32.totalorder %s3751_s9, %s3746_s11 }
 0x10f   : > { %p3755_p10 = scmp.lt.u32.totalorder %s3746_s11, %s4599_s30 }
 0x110   : > { %p3750_p2 = pneg %p3749_p11  ;;  %p3754_p8 = por %p3753_p6, %p3752_p12 }
 0x112   : > { %p3756_p0 = por %p3755_p10, %p3754_p8 }
 0x114   : > { %p3757_p3 = pnand %p3756_p0, %p3750_p2 }
 0x116   : > { %3760 = shalt.err (!%p3757_p3)
}
 0x117   : > { %s3761_s24 = scalar_lea.vmem %s526_s3, 16  ;;  %s4080_s20 = smov [#allocation11]  }
 0x118   : > { %p3762_p1 = scmp.ne.s32.totalorder %s526_s3, %s3761_s24  ;;  %s3766_s16 = sshll.u32 %s4080_s20, 4  ;;  %s3767_s16 = int_to_ptr.vmem [resolvable:$false] %s3766_s16 }
 0x119   : > { %s3768_s15 = scalar_lea.vmem %s3767_s16, 32  ;;  %p3769_p9 = scmp.lt.s32.totalorder %s526_s3, %s3767_s16 }
 0x11a   : > { %p3764_p13 = pnand %p3762_p1, %p5202_p4  ;;  %p3770_p7 = scmp.lt.s32.totalorder %s3768_s15, %s3761_s24 }
 0x11c   : > { %p3765_p5 = pneg %p3764_p13  ;;  %p3771_p11 = por %p3770_p7, %p3769_p9 }
 0x11e   : > { %p3772_p6 = pnand %p3771_p11, %p3765_p5 }
 0x120   : > { %3775 = shalt.err (!%p3772_p6)
}
 0x121   : > { %p5203_p12 = scmp.ne.s32.totalorder %s5189_s12, 0  ;;  %s5204_s21 = scalar_lea.sflag [#allocation10], %s4362_s10 }
 0x122   : > { %s4625_s8 = scalar_lea.hbm %s5085_s6, %s4574_s25  ;;  %s555_s11 = scalar_lea.vmem [#allocation14], %s4412_s22 }
 0x123   : > { %3224 = dma.hbm_to_vmem [thread:$0]  (!%p5203_p12), %s4599_s30, 16, %s526_s3, %s5204_s21  }
 0x124   : > { %s562_s5 = sshll.u32 %s555_s11, 4  ;;  %s3776_s18 = scalar_lea.hbm %s4625_s8, 16  ;;  %s563_s5 = int_to_ptr.vmem [resolvable:$true] %s562_s5 }
 0x125   : > { %p3777_p2 = scmp.ne.s32.totalorder %s4625_s8, %s3776_s18  ;;  %s3781_s30 = scalar_lea.hbm %s5085_s6, 64 }
 0x126   : > { %p3782_p0 = scmp.lt.u32.totalorder %s4625_s8, %s5085_s6  ;;  %p3783_p3 = scmp.lt.u32.totalorder %s3781_s30, %s3776_s18 }
 0x127   : > { %p3779_p8 = pnand %p3777_p2, %p5202_p4  ;;  %p3785_p13 = scmp.lt.u32.totalorder %s3776_s18, %s4625_s8 }
 0x128   : > { %p3784_p1 = por %p3783_p3, %p3782_p0 }
 0x129   : > { %p3780_p10 = pneg %p3779_p8 }
 0x12a   : > { %p3786_p5 = por %p3785_p13, %p3784_p1 }
 0x12c   : > { %p3787_p9 = pnand %p3786_p5, %p3780_p10 }
 0x12e   : > { %3790 = shalt.err (!%p3787_p9)
}
 0x12f   : > { %s3791_s24 = scalar_lea.vmem %s563_s5, 16  ;;  %s4081_s20 = smov [#allocation14]  }
 0x130   : > { %p3792_p7 = scmp.ne.s32.totalorder %s563_s5, %s3791_s24  ;;  %s3796_s16 = sshll.u32 %s4081_s20, 4  ;;  %s3797_s16 = int_to_ptr.vmem [resolvable:$false] %s3796_s16 }
 0x131   : > { %s3798_s15 = scalar_lea.vmem %s3797_s16, 32  ;;  %p3799_p2 = scmp.lt.s32.totalorder %s563_s5, %s3797_s16 }
 0x132   : > { %p3794_p11 = pnand %p3792_p7, %p5202_p4  ;;  %p3800_p8 = scmp.lt.s32.totalorder %s3798_s15, %s3791_s24 }
 0x134   : > { %p3795_p6 = pneg %p3794_p11  ;;  %p3801_p12 = por %p3800_p8, %p3799_p2 }
 0x136   : > { %p3802_p0 = pnand %p3801_p12, %p3795_p6 }
 0x138   : > { %3805 = shalt.err (!%p3802_p0)
}
 0x139   : > { %p5205_p3 = scmp.ne.s32.totalorder %s5189_s12, 0  ;;  %s5206_s21 = scalar_lea.sflag [#allocation13], %s4362_s10 }
 0x13a   : > { %s5207_s11 = sld [smem:[#allocation60_spill]]  ;;  %s592_s9 = scalar_lea.vmem [#allocation17], %s4412_s22 }
 0x13b   : > { %3230 = dma.hbm_to_vmem [thread:$0]  (!%p5205_p3), %s4625_s8, 16, %s563_s5, %s5206_s21  }
 0x13c   : > { %s599_s19 = sshll.u32 %s592_s9, 4  ;;  %s600_s19 = int_to_ptr.vmem [resolvable:$true] %s599_s19 }
 0x140   : > { %s4651_s18 = scalar_lea.hbm %s5207_s11, %s4574_s25  ;;  %s3811_s8 = scalar_lea.hbm %s5207_s11, 64 }
 0x141   : > { %s3806_s30 = scalar_lea.hbm %s4651_s18, 16  ;;  %p3812_p13 = scmp.lt.u32.totalorder %s4651_s18, %s5207_s11 }
 0x142   : > { %p3807_p12 = scmp.ne.s32.totalorder %s4651_s18, %s3806_s30  ;;  %p3813_p5 = scmp.lt.u32.totalorder %s3811_s8, %s3806_s30 }
 0x143   : > { %p3815_p7 = scmp.lt.u32.totalorder %s3806_s30, %s4651_s18 }
 0x144   : > { %p3809_p10 = pnand %p3807_p12, %p5202_p4  ;;  %p3814_p9 = por %p3813_p5, %p3812_p13 }
 0x146   : > { %p3810_p1 = pneg %p3809_p10  ;;  %p3816_p11 = por %p3815_p7, %p3814_p9 }
 0x148   : > { %p3817_p6 = pnand %p3816_p11, %p3810_p1 }
 0x14a   : > { %3820 = shalt.err (!%p3817_p6)
}
 0x14b   : > { %s3821_s22 = scalar_lea.vmem %s600_s19, 16  ;;  %s4082_s25 = smov [#allocation17]  }
 0x14c   : > { %p3822_p2 = scmp.ne.s32.totalorder %s600_s19, %s3821_s22  ;;  %s3826_s20 = sshll.u32 %s4082_s25, 4  ;;  %s3827_s20 = int_to_ptr.vmem [resolvable:$false] %s3826_s20 }
 0x14d   : > { %s3828_s16 = scalar_lea.vmem %s3827_s20, 32  ;;  %p3829_p12 = scmp.lt.s32.totalorder %s600_s19, %s3827_s20 }
 0x14e   : > { %p3824_p8 = pnand %p3822_p2, %p5202_p4  ;;  %p3830_p10 = scmp.lt.s32.totalorder %s3828_s16, %s3821_s22 }
 0x150   : > { %p3825_p0 = pneg %p3824_p8  ;;  %p3831_p3 = por %p3830_p10, %p3829_p12 }
 0x152   : > { %p3832_p5 = pnand %p3831_p3, %p3825_p0 }
 0x154   : > { %3835 = shalt.err (!%p3832_p5)
}
 0x155   : > { %p5208_p13 = scmp.ne.s32.totalorder %s5189_s12, 0  ;;  %s3011_s15 = sshll.u32 %s4060_s14, 12 }
 0x156   : > { %s5209_s1 = sld [smem:[#allocation61_spill]]  ;;  %s610_s30 = scalar_lea.vmem [#allocation18], %s4415_s27 }
 0x157   : > { %3236 = dma.hbm_to_vmem [thread:$0]  (!%p5208_p13), %s4651_s18, 16, %s600_s19, %s570_s17  }
 0x158   : > { %s618_s3 = sshll.u32 %s610_s30, 4  ;;  %s607_s23 = scalar_lea.sflag [#allocation19], %s4362_s10  ;;  %s4680_s3 = int_to_ptr.vmem [resolvable:$true] %s618_s3 }
 0x15c   : > { %s4677_s9 = scalar_lea.hbm %s5209_s1, %s3011_s15  ;;  %s3841_s19 = scalar_lea.hbm %s5209_s1, 16384 }
 0x15d   : > { %s3836_s8 = scalar_lea.hbm %s4677_s9, 4096  ;;  %p3842_p7 = scmp.lt.u32.totalorder %s4677_s9, %s5209_s1 }
 0x15e   : > { %p3837_p3 = scmp.ne.s32.totalorder %s4677_s9, %s3836_s8  ;;  %p3843_p11 = scmp.lt.u32.totalorder %s3841_s19, %s3836_s8 }
 0x15f   : > { %p3845_p2 = scmp.lt.u32.totalorder %s3836_s8, %s4677_s9 }
 0x160   : > { %p3839_p1 = pnand %p3837_p3, %p5202_p4  ;;  %p3844_p6 = por %p3843_p11, %p3842_p7 }
 0x162   : > { %p3840_p9 = pneg %p3839_p1  ;;  %p3846_p8 = por %p3845_p2, %p3844_p6 }
 0x164   : > { %p3847_p0 = pnand %p3846_p8, %p3840_p9 }
 0x166   : > { %3850 = shalt.err (!%p3847_p0)
}
 0x167   : > { %s3851_s27 = scalar_lea.vmem %s4680_s3, 4096  ;;  %s4083_s22 = smov [#allocation18]  }
 0x168   : > { %p3852_p12 = scmp.ne.s32.totalorder %s4680_s3, %s3851_s27  ;;  %s3856_s25 = sshll.u32 %s4083_s22, 4  ;;  %s3857_s25 = int_to_ptr.vmem [resolvable:$false] %s3856_s25 }
 0x169   : > { %s3858_s20 = scalar_lea.vmem %s3857_s25, 8192  ;;  %p3859_p3 = scmp.lt.s32.totalorder %s4680_s3, %s3857_s25 }
 0x16a   : > { %p3854_p10 = pnand %p3852_p12, %p5202_p4  ;;  %p3860_p1 = scmp.lt.s32.totalorder %s3858_s20, %s3851_s27 }
 0x16c   : > { %p3855_p5 = pneg %p3854_p10  ;;  %p3861_p7 = por %p3860_p1, %p3859_p3 }
 0x16e   : > { %p3862_p11 = pnand %p3861_p7, %p3855_p5 }
 0x170   : > { %3865 = shalt.err (!%p3862_p11)
}
 0x171   : > { %s4084_s16 = smov 16   ;;  %s5210_s26 = sld [smem:[#allocation50_spill]] }
 0x172   : > { %3239 = dma.hbm_to_vmem [thread:$0]  (!%p5208_p13), %s4677_s9, 4096, %s4680_s3, %s607_s23, %s4073_s28, %s4073_s28, %s4084_s16  }
 0x177   : > { %p5211_p4 = scmp.ne.s32.totalorder %s5210_s26, 0 }
 0x178   : > { %s5212_s15 = sld [smem:[#allocation39_spill]] (!%p5211_p4)  ;;  %s5213_s21 = sld [smem:[#allocation45_spill]] (!%p5211_p4) }
 0x179   : > { %630 = sbr.rel (%p5211_p4) target bundleno = 1999 (0x7cf), region = 64 }
 0x17e   : > { %s4711_s13 = sand.u32 (!%p5211_p4), 1, %s5212_s15   ;;  %p5214_p9 = scmp.ne.s32.totalorder (!%p5211_p4), %s5213_s21, 0 }
 0x17f   : > { %s4714_s30 = sshll.u32 (!%p5211_p4), %s4711_s13, 4  ;;  %s633_s12 = scalar_lea.sflag (!%p5211_p4), [#allocation4], %s4711_s13 }
 0x180   : > { %s636_s8 = scalar_lea.vmem [#allocation3], %s4714_s30 }
 0x181   : > { %3979 = dma.done.wait (%p5214_p9), %s633_s12, 256  }
 0x182   : > { %3981 = vsyncadd (%p5214_p9), %s633_s12, 4294967040  ;;  %s5215_s10 = sld [smem:[#allocation44_spill]]  ;;  %s645_s3 = scalar_lea.vmem [#allocation6], %s4714_s30 }
 0x188   : > { %s641_s28 = sand.u32 1, %s5215_s10  }
 0x189   : > { %s642_s9 = scalar_lea.sflag [#allocation7], %s641_s28 }
 0x18a   : > { %3983 = dma.done.wait (%p5214_p9), %s642_s9, 512  }
 0x18b   : > { %3985 = vsyncadd (%p5214_p9), %s642_s9, 4294966784  ;;  %s5216_s23 = sld [smem:[#allocation36_spill]]  ;;  %s654_s5 = scalar_lea.vmem [#allocation8], %s4714_s30 }
 0x18c   : > { %s5217_s17 = sld [smem:[#allocation46_spill]]  ;;  %s660_s24 = scalar_lea.sflag [#allocation10], %s641_s28 }
 0x191   : > { %s4729_s18 = sand.u32 1, %s5216_s23  }
 0x192   : > { %s2841_s19 = sshll.u32 %s4729_s18, 8  ;;  %p5218_p13 = scmp.ne.s32.totalorder %s5217_s17, 0 }
 0x193   : > { %s4733_s27 = scalar_lea.vmem [#allocation9], %s2841_s19 }
 0x194   : > { %3987 = dma.done.wait (%p5218_p13), %s660_s24, 4112  }
 0x195   : > { %3989 = vsyncadd (%p5218_p13), %s660_s24, 4294963184  ;;  %s671_s22 = scalar_lea.vmem [#allocation11], %s4729_s18  ;;  %s677_s25 = scalar_lea.sflag [#allocation13], %s641_s28 }
 0x196   : > { %s4740_s20 = scalar_lea.vmem [#allocation12], %s2841_s19 }
 0x197   : > { %3991 = dma.done.wait (%p5218_p13), %s677_s25, 4112  }
 0x198   : > { %3993 = vsyncadd (%p5218_p13), %s677_s25, 4294963184  ;;  %s688_s16 = scalar_lea.vmem [#allocation14], %s4729_s18  ;;  %s694_s26 = scalar_lea.sflag [#allocation16], %s641_s28 }
 0x199   : > { %s4747_s15 = scalar_lea.vmem [#allocation15], %s2841_s19 }
 0x19a   : > { %3995 = dma.done.wait (%p5218_p13), %s694_s26, 4112  }
 0x19b   : > { %3997 = vsyncadd (%p5218_p13), %s694_s26, 4294963184  ;;  %s705_s21 = scalar_lea.vmem [#allocation17], %s4729_s18  ;;  %s711_s12 = scalar_lea.sflag [#allocation19], %s641_s28 }
 0x19c   : > { %s4754_s9 = scalar_lea.vmem [#allocation18], %s2841_s19 }
 0x19d   : > { %3999 = dma.done.wait (%p5218_p13), %s711_s12, 4096  }
 0x19e   : > { %4001 = vsyncadd (%p5218_p13), %s711_s12, 4294963200  ;;  %p5219_p6 = scmp.eq.s32.totalorder %s5215_s10, 0 }
 0x1a0   : > { %4003 = dma.done.wait (%p5219_p6), [#allocation19], 64   ;;  %p5220_p2 = pmov %p5219_p6 }
 0x1a1   : > { %s2846_s28 = sshll.u32 %s4711_s13, 5  ;;  %v3374_v0 = vld [vmem:[%s4733_s27 + $0x40] sm:$0xff]   ;;  %v3378_v4 = vld [vmem:[%s4733_s27 + $0x48] sm:$0xff]   ;;  %v3382_v8 = vld [vmem:[%s4733_s27 + $0x50] sm:$0xff]   ;;  %vm4086_vm0 = vmmov 0   ;;  %vm1888_vm1 = vcmask 523264  }
 0x1a2   : > { %4005 = vsyncadd (%p5220_p2), [#allocation19], 4294967232  ;;  %v3375_v1 = vld [vmem:[%s4733_s27 + $0xc0] sm:$0xff]   ;;  %3013 = vmatprep.subr.bf16.mxu0 %v3374_v0  ;;  %v3379_v5 = vld [vmem:[%s4733_s27 + $0xc8] sm:$0xff]   ;;  %s4087_s30 = smov 64   ;;  %vm1954_vm2 = vcmask 1043456  }
 0x1a3   : > { %v3376_v2 = vld [vmem:[%s4733_s27] sm:$0xff]   ;;  %3035 = vmatprep.subr.bf16.mxu1 %v3375_v1  ;;  %v3380_v6 = vld [vmem:[%s4733_s27 + $0x8] sm:$0xff]   ;;  %v3383_v9 = vld [vmem:[%s4733_s27 + $0xd0] sm:$0xff]   ;;  %vm1936_vm3 = vcmask 64512   ;;  %s4921_s17 = scalar_lea.vmem [#allocation21], %s2846_s28  ;;  %s5222_s18 = sld [smem:[#allocation40_spill]] }
 0x1a4   : > { %v3377_v3 = vld [vmem:[%s4733_s27 + $0x80] sm:$0xff]   ;;  %3014 = vmatpush3.bf16.msra.mxu0 %v3376_v2  ;;  %v3381_v7 = vld [vmem:[%s4733_s27 + $0x88] sm:$0xff]   ;;  %v3384_v10 = vld [vmem:[%s4733_s27 + $0x10] sm:$0xff]  }
 0x1a5   : > { %3036 = vmatpush3.bf16.msra.mxu1 %v3377_v3  ;;  %3015 = vmatprep.subr.bf16.mxu0 %v3378_v4  ;;  %v3385_v11 = vld [vmem:[%s4733_s27 + $0x90] sm:$0xff]   ;;  %v3386_v12 = vld [vmem:[%s4733_s27 + $0x58] sm:$0xff]   ;;  %v3390_v16 = vld [vmem:[%s4733_s27 + $0x60] sm:$0xff]  }
 0x1a6   : > { %3037 = vmatprep.subr.bf16.mxu1 %v3379_v5  ;;  %v3387_v13 = vld [vmem:[%s4733_s27 + $0xd8] sm:$0xff]   ;;  %v3391_v17 = vld [vmem:[%s4733_s27 + $0xe0] sm:$0xff]   ;;  %v3394_v20 = vld [vmem:[%s4733_s27 + $0x68] sm:$0xff]  }
 0x1a7   : > { %v3388_v14 = vld [vmem:[%s4733_s27 + $0x18] sm:$0xff]   ;;  %v3392_v18 = vld [vmem:[%s4733_s27 + $0x20] sm:$0xff]   ;;  %v3395_v21 = vld [vmem:[%s4733_s27 + $0xe8] sm:$0xff]  }
 0x1a8   : > { %3016 = vmatpush3.bf16.msra.mxu0 %v3380_v6  ;;  %v3389_v15 = vld [vmem:[%s4733_s27 + $0x98] sm:$0xff]   ;;  %v3393_v19 = vld [vmem:[%s4733_s27 + $0xa0] sm:$0xff]   ;;  %v3396_v22 = vld [vmem:[%s4733_s27 + $0x28] sm:$0xff]  }
 0x1a9   : > { %3038 = vmatpush3.bf16.msra.mxu1 %v3381_v7  ;;  %3017 = vmatprep.subr.bf16.mxu0 %v3382_v8  ;;  %v3397_v23 = vld [vmem:[%s4733_s27 + $0xa8] sm:$0xff]   ;;  %v3398_v24 = vld [vmem:[%s4733_s27 + $0x70] sm:$0xff]   ;;  %v3402_v28 = vld [vmem:[%s4733_s27 + $0x78] sm:$0xff]   ;;  %p2964_p8 = scmp.ne.s32.totalorder %s5222_s18, 0 }
 0x1aa   : > { %3039 = vmatprep.subr.bf16.mxu1 %v3383_v9  ;;  %v3399_v25 = vld [vmem:[%s4733_s27 + $0xf0] sm:$0xff]   ;;  %v3403_v29 = vld [vmem:[%s4733_s27 + $0xf8] sm:$0xff]   ;;  %v3410_v38 = vld [vmem:[%s4740_s20 + $0x40] sm:$0xff]  }
 0x1ab   : > { %v3400_v26 = vld [vmem:[%s4733_s27 + $0x30] sm:$0xff]   ;;  %v3404_v30 = vld [vmem:[%s4733_s27 + $0x38] sm:$0xff]   ;;  %v3411_v39 = vld [vmem:[%s4740_s20 + $0xc0] sm:$0xff]  }
 0x1ac   : > { %3018 = vmatpush3.bf16.msra.mxu0 %v3384_v10  ;;  %v3401_v27 = vld [vmem:[%s4733_s27 + $0xb0] sm:$0xff]   ;;  %v3405_v31 = vld [vmem:[%s4733_s27 + $0xb8] sm:$0xff]   ;;  %v3412_v40 = vld [vmem:[%s4740_s20] sm:$0xff]  }
 0x1ad   : > { %3040 = vmatpush3.bf16.msra.mxu1 %v3385_v11  ;;  %3019 = vmatprep.subr.bf16.mxu0 %v3386_v12  ;;  %v809_v32 = vld [vmem:[%s636_s8] sm:$0xff]  ;;  %v810_v33 = vld [vmem:[%s636_s8 + $0x8] sm:$0xff]  ;;  %s5221_s8 = sld [smem:[#allocation34_spill]] }
 0x1ae   : > { %3041 = vmatprep.subr.bf16.mxu1 %v3387_v13  ;;  %v2849_v34 = vcombine.low %v809_v32, %v809_v32  ;;  %v2850_v35 = vcombine.high %v809_v32, %v809_v32  ;;  %v2851_v36 = vcombine.low %v810_v33, %v810_v33  ;;  %v2852_v37 = vcombine.high %v810_v33, %v810_v33  ;;  %v3413_v41 = vld [vmem:[%s4740_s20 + $0x80] sm:$0xff]   ;;  %v3414_v42 = vld [vmem:[%s4740_s20 + $0x48] sm:$0xff]   ;;  %v3418_v46 = vld [vmem:[%s4740_s20 + $0x50] sm:$0xff]  }
 0x1af   : > { %v3415_v43 = vld [vmem:[%s4740_s20 + $0xc8] sm:$0xff]   ;;  %v3419_v47 = vld [vmem:[%s4740_s20 + $0xd0] sm:$0xff]   ;;  %v3422_v50 = vld [vmem:[%s4740_s20 + $0x58] sm:$0xff]  }
 0x1b0   : > { %3020 = vmatpush3.bf16.msra.mxu0 %v3388_v14  ;;  %1124 = vmatprep.mubr.bf16.mxu0 %v2850_v35  ;;  %v3416_v44 = vld [vmem:[%s4740_s20 + $0x8] sm:$0xff]   ;;  %v3420_v48 = vld [vmem:[%s4740_s20 + $0x10] sm:$0xff]   ;;  %v3423_v51 = vld [vmem:[%s4740_s20 + $0xd8] sm:$0xff]  }
 0x1b1   : > { %3042 = vmatpush3.bf16.msra.mxu1 %v3389_v15  ;;  %3021 = vmatprep.subr.bf16.mxu0 %v3390_v16  ;;  %v3417_v45 = vld [vmem:[%s4740_s20 + $0x88] sm:$0xff]   ;;  %v3421_v49 = vld [vmem:[%s4740_s20 + $0x90] sm:$0xff]   ;;  %v3424_v52 = vld [vmem:[%s4740_s20 + $0x18] sm:$0xff]  }
 0x1b2   : > { %3043 = vmatprep.subr.bf16.mxu1 %v3391_v17  ;;  %1164 = vmatprep.mubr.bf16.mxu1 %v2852_v37  ;;  %v3425_v53 = vld [vmem:[%s4740_s20 + $0x98] sm:$0xff]   ;;  %v3426_v54 = vld [vmem:[%s4740_s20 + $0x60] sm:$0xff]   ;;  %v3430_v58 = vld [vmem:[%s4740_s20 + $0x68] sm:$0xff]  }
 0x1b3   : > { %v3427_v55 = vld [vmem:[%s4740_s20 + $0xe0] sm:$0xff]   ;;  %v3431_v59 = vld [vmem:[%s4740_s20 + $0xe8] sm:$0xff]   ;;  %v3434_v62 = vld [vmem:[%s4740_s20 + $0x70] sm:$0xff]   ;;  %s803_s10 = sand.u32 1, %s5221_s8  }
 0x1b4   : > { %3022 = vmatpush3.bf16.msra.mxu0 %v3392_v18  ;;  %v3428_v56 = vld [vmem:[%s4740_s20 + $0x20] sm:$0xff]   ;;  %v3432_v60 = vld [vmem:[%s4740_s20 + $0x28] sm:$0xff]   ;;  %v3435_v63 = vld [vmem:[%s4740_s20 + $0xf0] sm:$0xff]  }
 0x1b5   : > { %3044 = vmatpush3.bf16.msra.mxu1 %v3393_v19  ;;  %3023 = vmatprep.subr.bf16.mxu0 %v3394_v20  ;;  %v3429_v57 = vld [vmem:[%s4740_s20 + $0xa0] sm:$0xff]   ;;  %v3433_v61 = vld [vmem:[%s4740_s20 + $0xa8] sm:$0xff]   ;;  %v3436_v0 = vld [vmem:[%s4740_s20 + $0x30] sm:$0xff]  }
 0x1b6   : > { %3045 = vmatprep.subr.bf16.mxu1 %v3395_v21  ;;  %v3437_v1 = vld [vmem:[%s4740_s20 + $0xb0] sm:$0xff]   ;;  %v3438_v2 = vld [vmem:[%s4740_s20 + $0x78] sm:$0xff]   ;;  %v3446_v12 = vld [vmem:[%s4747_s15 + $0x40] sm:$0xff]  }
 0x1b7   : > { %v3439_v3 = vld [vmem:[%s4740_s20 + $0xf8] sm:$0xff]   ;;  %v3447_v13 = vld [vmem:[%s4747_s15] sm:$0xff]   ;;  %v3448_v14 = vld [vmem:[%s4747_s15 + $0x48] sm:$0xff]  }
 0x1b8   : > { %3024 = vmatpush3.bf16.msra.mxu0 %v3396_v22  ;;  %v3440_v4 = vld [vmem:[%s4740_s20 + $0x38] sm:$0xff]   ;;  %v3449_v15 = vld [vmem:[%s4747_s15 + $0x8] sm:$0xff]   ;;  %v3454_v20 = vld [vmem:[%s4747_s15 + $0x60] sm:$0xff]  }
 0x1b9   : > { %3046 = vmatpush3.bf16.msra.mxu1 %v3397_v23  ;;  %3025 = vmatprep.subr.bf16.mxu0 %v3398_v24  ;;  %v3441_v5 = vld [vmem:[%s4740_s20 + $0xb8] sm:$0xff]   ;;  %v3455_v21 = vld [vmem:[%s4747_s15 + $0x20] sm:$0xff]   ;;  %v3456_v22 = vld [vmem:[%s4747_s15 + $0x68] sm:$0xff]  }
 0x1ba   : > { %3047 = vmatprep.subr.bf16.mxu1 %v3399_v25  ;;  %v811_v6 = vld [vmem:[%s645_s3] sm:$0xff]  ;;  %v812_v9 = vld [vmem:[%s645_s3 + $0x8] sm:$0xff]  ;;  %s2847_s3 = sshll.u32 %s803_s10, 4 }
 0x1bb   : > { %v2886_v7 = vcombine.low %v811_v6, %v811_v6  ;;  %v2887_v8 = vcombine.high %v811_v6, %v811_v6  ;;  %v2888_v10 = vcombine.low %v812_v9, %v812_v9  ;;  %v2889_v11 = vcombine.high %v812_v9, %v812_v9  ;;  %v3450_v16 = vld [vmem:[%s4747_s15 + $0x50] sm:$0xff]   ;;  %v3452_v18 = vld [vmem:[%s4747_s15 + $0x58] sm:$0xff]   ;;  %v3457_v23 = vld [vmem:[%s4747_s15 + $0x28] sm:$0xff]   ;;  %s4904_s23 = scalar_lea.vmem [#allocation22], %s2847_s3 }
 0x1bc   : > { %3026 = vmatpush3.bf16.msra.mxu0 %v3400_v26  ;;  %v3451_v17 = vld [vmem:[%s4747_s15 + $0x10] sm:$0xff]   ;;  %v3453_v19 = vld [vmem:[%s4747_s15 + $0x18] sm:$0xff]   ;;  %v3464_v32 = vld [vmem:[%s4747_s15 + $0xc0] sm:$0xff]  }
 0x1bd   : > { %3048 = vmatpush3.bf16.msra.mxu1 %v3401_v27  ;;  %3027 = vmatprep.subr.bf16.mxu0 %v3402_v28  ;;  %v3458_v24 = vld [vmem:[%s4747_s15 + $0x70] sm:$0xff]   ;;  %v3460_v26 = vld [vmem:[%s4747_s15 + $0x78] sm:$0xff]   ;;  %v3465_v33 = vld [vmem:[%s4747_s15 + $0x80] sm:$0xff]  }
 0x1be   : > { %3049 = vmatprep.subr.bf16.mxu1 %v3403_v29  ;;  %v3459_v25 = vld [vmem:[%s4747_s15 + $0x30] sm:$0xff]   ;;  %v3461_v27 = vld [vmem:[%s4747_s15 + $0x38] sm:$0xff]   ;;  %v3467_v35 = vld [vmem:[%s4747_s15 + $0x88] sm:$0xff]  }
 0x1bf   : > { %v813_v28 = vld [vmem:[%s654_s5] sm:$0xff]  ;;  %v814_v37 = vld [vmem:[%s654_s5 + $0x8] sm:$0xff] }
 0x1c0   : > { %3028 = vmatpush3.bf16.msra.mxu0 %v3404_v30  ;;  %v2923_v29 = vcombine.low %v813_v28, %v813_v28  ;;  %v2924_v30 = vcombine.high %v813_v28, %v813_v28 }
 0x1c1   : > { %3050 = vmatpush3.bf16.msra.mxu1 %v3405_v31  ;;  %3057 = vmatprep.subr.bf16.mxu0 %v3410_v38  ;;  %v4085_v31 = vmov 0.0   ;;  %v2926_v38 = vcombine.high %v814_v37, %v814_v37 }
 0x1c2   : > { %3079 = vmatprep.subr.bf16.mxu1 %v3411_v39  ;;  %v3469_v39 = vld [vmem:[%s4747_s15 + $0x90] sm:$0xff]  }
 0x1c3   : > { %1125 = vmatmul.mubr.bf16.vlgmr.msra.gmra.mrb[0].mxu0 %v2849_v34  ;;  %v3466_v34 = vld [vmem:[%s4747_s15 + $0xc8] sm:$0xff]  }
 0x1c4   : > { %1165 = vmatmul.mubr.bf16.vlgmr.msra.gmra.mrb[0].mxu1 %v2851_v36  ;;  %3058 = vmatpush3.bf16.msra.mxu0 %v3412_v40  ;;  %v3468_v36 = vld [vmem:[%s4747_s15 + $0xd0] sm:$0xff]   ;;  %v3470_v40 = vld [vmem:[%s4747_s15 + $0xd8] sm:$0xff]  }
 0x1c5   : > { %3080 = vmatpush3.bf16.msra.mxu1 %v3413_v41  ;;  %3059 = vmatprep.subr.bf16.mxu0 %v3414_v42  ;;  %v3471_v41 = vld [vmem:[%s4747_s15 + $0x98] sm:$0xff]   ;;  %v3472_v42 = vld [vmem:[%s4747_s15 + $0xe0] sm:$0xff]  }
 0x1c6   : > { %3081 = vmatprep.subr.bf16.mxu1 %v3415_v43  ;;  %1481 = vmatprep.mubr.bf16.mxu0 %v2887_v8  ;;  %v3473_v43 = vld [vmem:[%s4747_s15 + $0xa0] sm:$0xff]  }
 0x1c7   : > { %1521 = vmatprep.mubr.bf16.mxu1 %v2889_v11 }
 0x1c8   : > { %3060 = vmatpush3.bf16.msra.mxu0 %v3416_v44  ;;  %v3474_v44 = vld [vmem:[%s4747_s15 + $0xe8] sm:$0xff]  }
 0x1c9   : > { %3082 = vmatpush3.bf16.msra.mxu1 %v3417_v45  ;;  %3061 = vmatprep.subr.bf16.mxu0 %v3418_v46  ;;  %v3475_v45 = vld [vmem:[%s4747_s15 + $0xa8] sm:$0xff]   ;;  %v3476_v46 = vld [vmem:[%s4747_s15 + $0xf0] sm:$0xff]  }
 0x1ca   : > { %3083 = vmatprep.subr.bf16.mxu1 %v3419_v47  ;;  %v3477_v47 = vld [vmem:[%s4747_s15 + $0xb0] sm:$0xff]  }
 0x1cc   : > { %3062 = vmatpush3.bf16.msra.mxu0 %v3420_v48  ;;  %v3478_v48 = vld [vmem:[%s4747_s15 + $0xf8] sm:$0xff]  }
 0x1cd   : > { %3084 = vmatpush3.bf16.msra.mxu1 %v3421_v49  ;;  %3063 = vmatprep.subr.bf16.mxu0 %v3422_v50  ;;  %v3479_v49 = vld [vmem:[%s4747_s15 + $0xb8] sm:$0xff]   ;;  %v2925_v50 = vcombine.low %v814_v37, %v814_v37 }
 0x1ce   : > { %3085 = vmatprep.subr.bf16.mxu1 %v3423_v51 }
 0x1d0   : > { %3064 = vmatpush3.bf16.msra.mxu0 %v3424_v52 }
 0x1d1   : > { %3086 = vmatpush3.bf16.msra.mxu1 %v3425_v53  ;;  %3065 = vmatprep.subr.bf16.mxu0 %v3426_v54  ;;  %v2848_v53 = vld [vmem:[%s671_s22] ss:$0 sm:$0xff] }
 0x1d2   : > { %3087 = vmatprep.subr.bf16.mxu1 %v3427_v55 }
 0x1d4   : > { %3066 = vmatpush3.bf16.msra.mxu0 %v3428_v56 }
 0x1d5   : > { %3088 = vmatpush3.bf16.msra.mxu1 %v3429_v57  ;;  %3067 = vmatprep.subr.bf16.mxu0 %v3430_v58 }
 0x1d6   : > { %3089 = vmatprep.subr.bf16.mxu1 %v3431_v59 }
 0x1d8   : > { %3068 = vmatpush3.bf16.msra.mxu0 %v3432_v60 }
 0x1d9   : > { %3090 = vmatpush3.bf16.msra.mxu1 %v3433_v61  ;;  %3069 = vmatprep.subr.bf16.mxu0 %v3434_v62 }
 0x1da   : > { %3091 = vmatprep.subr.bf16.mxu1 %v3435_v63 }
 0x1dc   : > { %3070 = vmatpush3.bf16.msra.mxu0 %v3436_v0 }
 0x1dd   : > { %3092 = vmatpush3.bf16.msra.mxu1 %v3437_v1  ;;  %3071 = vmatprep.subr.bf16.mxu0 %v3438_v2  ;;  %v2885_v2 = vld [vmem:[%s688_s16] ss:$0 sm:$0xff] }
 0x1de   : > { %3093 = vmatprep.subr.bf16.mxu1 %v3439_v3 }
 0x1e0   : > { %3072 = vmatpush3.bf16.msra.mxu0 %v3440_v4 }
 0x1e1   : > { %3094 = vmatpush3.bf16.msra.mxu1 %v3441_v5  ;;  %3101 = vmatprep.subr.bf16.mxu0 %v3446_v12 }
 0x1e2   : > { %3123 = vmatprep.subr.bf16.mxu1 %v3464_v32 }
 0x1e3   : > { %1482 = vmatmul.mubr.bf16.vlgmr.msra.gmra.mrb[4].mxu0 %v2886_v7 }
 0x1e4   : > { %1522 = vmatmul.mubr.bf16.vlgmr.msra.gmra.mrb[4].mxu1 %v2888_v10  ;;  %3102 = vmatpush3.bf16.msra.mxu0 %v3447_v13 }
 0x1e5   : > { %3103 = vmatprep.subr.bf16.mxu0 %v3448_v14  ;;  %1838 = vmatprep.mubr.bf16.mxu0 %v2924_v30 }
 0x1e6   : > { %3124 = vmatpush3.bf16.msra.mxu1 %v3465_v33  ;;  %1878 = vmatprep.mubr.bf16.mxu1 %v2926_v38 }
 0x1e7   : > { %3125 = vmatprep.subr.bf16.mxu1 %v3466_v34 }
 0x1e8   : > { %3104 = vmatpush3.bf16.msra.mxu0 %v3449_v15 }
 0x1e9   : > { %3105 = vmatprep.subr.bf16.mxu0 %v3450_v16 }
 0x1ea   : > { %3126 = vmatpush3.bf16.msra.mxu1 %v3467_v35 }
 0x1eb   : > { %3127 = vmatprep.subr.bf16.mxu1 %v3468_v36 }
 0x1ec   : > { %3106 = vmatpush3.bf16.msra.mxu0 %v3451_v17 }
 0x1ed   : > { %3107 = vmatprep.subr.bf16.mxu0 %v3452_v18 }
 0x1ee   : > { %3128 = vmatpush3.bf16.msra.mxu1 %v3469_v39 }
 0x1ef   : > { %3129 = vmatprep.subr.bf16.mxu1 %v3470_v40 }
 0x1f0   : > { %3108 = vmatpush3.bf16.msra.mxu0 %v3453_v19 }
 0x1f1   : > { %3109 = vmatprep.subr.bf16.mxu0 %v3454_v20 }
 0x1f2   : > { %3130 = vmatpush3.bf16.msra.mxu1 %v3471_v41 }
 0x1f3   : > { %3131 = vmatprep.subr.bf16.mxu1 %v3472_v42 }
 0x1f4   : > { %3110 = vmatpush3.bf16.msra.mxu0 %v3455_v21 }
 0x1f5   : > { %3111 = vmatprep.subr.bf16.mxu0 %v3456_v22 }
 0x1f6   : > { %3132 = vmatpush3.bf16.msra.mxu1 %v3473_v43 }
 0x1f7   : > { %3133 = vmatprep.subr.bf16.mxu1 %v3474_v44 }
 0x1f8   : > { %3112 = vmatpush3.bf16.msra.mxu0 %v3457_v23 }
 0x1f9   : > { %3113 = vmatprep.subr.bf16.mxu0 %v3458_v24  ;;  %v2922_v24 = vld [vmem:[%s705_s21] ss:$0 sm:$0xff] }
 0x1fa   : > { %3134 = vmatpush3.bf16.msra.mxu1 %v3475_v45 }
 0x1fb   : > { %3135 = vmatprep.subr.bf16.mxu1 %v3476_v46 }
 0x1fc   : > { %3114 = vmatpush3.bf16.msra.mxu0 %v3459_v25 }
 0x1fd   : > { %3115 = vmatprep.subr.bf16.mxu0 %v3460_v26 }
 0x1fe   : > { %3136 = vmatpush3.bf16.msra.mxu1 %v3477_v47 }
 0x1ff   : > { %3137 = vmatprep.subr.bf16.mxu1 %v3478_v48 }
 0x200   : > { %3116 = vmatpush3.bf16.msra.mxu0 %v3461_v27 }
 0x201   : > { %3153 = vmatprep.subr.bf16.mxu0 %v4085_v31 }
 0x202   : > { %3138 = vmatpush3.bf16.msra.mxu1 %v3479_v49 }
 0x203   : > { %1839 = vmatmul.mubr.bf16.vlgmr.msra.gmra.mrb[8].mxu0 %v2923_v29  ;;  %3159 = vmatprep.subr.bf16.mxu1 %v4085_v31 }
 0x204   : > { %3155 = vmatprep.mubr.msk.bf16.mxu0 %vm4086_vm0, %v4085_v31 }
 0x205   : > { %1879 = vmatmul.mubr.bf16.vlgmr.msra.gmra.mrb[8].mxu1 %v2925_v50 }
 0x206   : > { %3161 = vmatprep.mubr.msk.bf16.mxu1 %vm4086_vm0, %v4085_v31 }
 0x296   : > { %v3029_v51 = vpop.f32.mrb[0].mxu0 }
 0x297   : > { %v3051_v52 = vpop.f32.mrb[0].mxu1  ;;  %v3030_v54 = vpop.f32.mrb[1].mxu0 }
 0x298   : > { %v3052_v55 = vpop.f32.mrb[1].mxu1  ;;  %v3031_v56 = vadd.f32 %v3030_v54, %v3029_v51  ;;  %v3032_v58 = vpop.f32.mrb[2].mxu0 }
 0x299   : > { %v3053_v57 = vadd.f32 %v3052_v55, %v3051_v52  ;;  %v3054_v59 = vpop.f32.mrb[2].mxu1  ;;  %v3033_v60 = vpop.f32.mrb[3].mxu0 }
 0x29a   : > { %v3055_v61 = vpop.f32.mrb[3].mxu1  ;;  %v1127_v62 = vadd.f32 %v3031_v56, %v2848_v53 }
 0x29c   : > { %v1167_v63 = vadd.f32 %v3053_v57, %v1127_v62 }
 0x29e   : > { %v1886_v15 = vpack.c.bf16 %v1167_v63, %v1167_v63 }
 0x2b6   : > { %v3073_v0 = vpop.f32.mrb[4].mxu0 }
 0x2b7   : > { %v3095_v1 = vpop.f32.mrb[4].mxu1  ;;  %v3074_v3 = vpop.f32.mrb[5].mxu0 }
 0x2b8   : > { %v3096_v4 = vpop.f32.mrb[5].mxu1  ;;  %v3075_v5 = vadd.f32 %v3074_v3, %v3073_v0  ;;  %v3076_v7 = vpop.f32.mrb[6].mxu0 }
 0x2b9   : > { %v3097_v6 = vadd.f32 %v3096_v4, %v3095_v1  ;;  %v3098_v8 = vpop.f32.mrb[6].mxu1  ;;  %v3077_v9 = vpop.f32.mrb[7].mxu0 }
 0x2ba   : > { %v3099_v10 = vpop.f32.mrb[7].mxu1  ;;  %v1484_v11 = vadd.f32 %v3075_v5, %v2885_v2 }
 0x2bc   : > { %v1524_v12 = vadd.f32 %v3097_v6, %v1484_v11 }
 0x2be   : > { %v1887_v13 = vpack.c.bf16 %v1524_v12, %v1524_v12  ;;  %v2125_v12 = vlaneseq (!%p2964_p8) }
 0x2c0   : > { %2002 = vrot.lane.b32.xlu0 %v1887_v13, %s4087_s30  ;;  %v1893_v14 = vsel %vm1888_vm1, %v1887_v13, 0  ;;  %v2126_v13 = vshrl.u32 (!%p2964_p8), %v2125_v12, 7 }
 0x2c1   : > { %3154 = vmatpush3.bf16.xpose.msra.mxu0 %v1893_v14  ;;  %v2123_v14 = vld [vmem:[#allocation20] sm:$0xf] (!%p2964_p8) }
 0x2c2   : > { %3165 = vmatprep.subr.bf16.mxu0 %v4085_v31 }
 0x2c4   : > { %1999 = vrot.lane.b32.xlu0 %v1886_v15, %s4087_s30 }
 0x2c8   : > { %3156 = vmatmul.mubr.msk.bf16.vlgmr.msra.gmra.mrb[12].mxu0 %vm1888_vm1, %v1886_v15  ;;  %v2127_v15 = vsub.s32 (!%p2964_p8), 0, %v2126_v13 }
 0x2c9   : > { %3167 = vmatprep.mubr.msk.bf16.mxu0 %vm4086_vm0, %v4085_v31 }
 0x2d6   : > { %v3117_v16 = vpop.f32.mrb[8].mxu0 }
 0x2d7   : > { %v3118_v17 = vpop.f32.mrb[9].mxu0 }
 0x2d8   : > { %v3119_v18 = vadd.f32 %v3118_v17, %v3117_v16  ;;  %v3120_v19 = vpop.f32.mrb[10].mxu0  ;;  %v3139_v26 = vpop.f32.mrb[8].mxu1  ;;  %v2131_v16 = vsub.s32 (!%p2964_p8), 1, %v2126_v13  ;;  %v2135_v17 = vsub.s32 (!%p2964_p8), 2, %v2126_v13 }
 0x2d9   : > { %v3121_v20 = vpop.f32.mrb[11].mxu0  ;;  %v3140_v27 = vpop.f32.mrb[9].mxu1  ;;  %v2128_v19 = vrot.slane (!%p2964_p8), %v2123_v14, %v2127_v15 }
 0x2da   : > { %v1841_v25 = vadd.f32 %v3119_v18, %v2922_v24  ;;  %v3141_v28 = vadd.f32 %v3140_v27, %v3139_v26  ;;  %v3142_v29 = vpop.f32.mrb[10].mxu1  ;;  %v2139_v18 = vsub.s32 (!%p2964_p8), 3, %v2126_v13  ;;  %v2132_v20 = vrot.slane (!%p2964_p8), %v2123_v14, %v2131_v16 }
 0x2db   : > { %v3143_v30 = vpop.f32.mrb[11].mxu1  ;;  %2145 = vst [vmem:[#allocation2] sm:$0xff] (!%p2964_p8), %v2128_v19 }
 0x2dc   : > { %v1881_v32 = vadd.f32 %v3141_v28, %v1841_v25  ;;  %2146 = vst [vmem:[#allocation2 + $0x8] sm:$0xff] (!%p2964_p8), %v2132_v20 }
 0x2de   : > { %v1950_v33 = vpack.c.bf16 %v1881_v32, %v1881_v32 }
 0x2e0   : > { %v1956_v34 = vsel %vm1954_vm2, %v1950_v33, 0 }
 0x2e1   : > { %3160 = vmatpush3.bf16.msra.mxu1 %v1956_v34 }
 0x2e2   : > { %3171 = vmatprep.subr.bf16.mxu1 %v4085_v31 }
 0x332   : > { %v2003_v21 = vpop.permute.xlu0 %2002 }
 0x333   : > { %v2008_v22 = vsel %vm1888_vm1, %v2003_v21, 0  ;;  %v2136_v21 = vrot.slane (!%p2964_p8), %v2123_v14, %v2135_v17 }
 0x334   : > { %3166 = vmatpush3.bf16.xpose.msra.mxu0 %v2008_v22  ;;  %v2140_v22 = vrot.slane (!%p2964_p8), %v2123_v14, %v2139_v18 }
 0x335   : > { %2147 = vst [vmem:[#allocation2 + $0x10] sm:$0xff] (!%p2964_p8), %v2136_v21 }
 0x336   : > { %v2000_v23 = vpop.permute.xlu0 %1999  ;;  %2148 = vst [vmem:[#allocation2 + $0x18] sm:$0xff] (!%p2964_p8), %v2140_v22 }
 0x33b   : > { %3168 = vmatmul.mubr.msk.bf16.vlgmr.msra.gmra.mrb[16].mxu0 %vm1888_vm1, %v2000_v23 }
 0x39b   : > { %v1929_v35 = vpop.f32.mrb[12].mxu0 }
 0x39c   : > { %v1935_v36 = vmul.f32 0.125, %v1929_v35  ;;  %v3157_v37 = vpop.f32.mrb[13].mxu0 }
 0x39d   : > { %v1932_v38 = vpop.f32.mrb[14].mxu0 }
 0x39e   : > { %v3158_v39 = vpop.f32.mrb[15].mxu0  ;;  %v1937_v40 = vsel %vm1936_vm3, %v1935_v36, -inf }
 0x39f   : > { %1938 = vmax.xlane.f32.xlu1 %v1937_v40 }
 0x40e   : > { %v2044_v41 = vpop.f32.mrb[16].mxu0 }
 0x40f   : > { %v2050_v42 = vmul.f32 0.125, %v2044_v41  ;;  %v3169_v43 = vpop.f32.mrb[17].mxu0 }
 0x410   : > { %v2047_v44 = vpop.f32.mrb[18].mxu0 }
 0x411   : > { %v3170_v45 = vpop.f32.mrb[19].mxu0  ;;  %v2051_v46 = vsel %vm1936_vm3, %v2050_v42, -inf }
 0x412   : > { %2052 = vmax.xlane.f32.xlu1 %v2051_v46 }
 0x42c   : > { %v1939_v47 = vpop.xlane.xlu1 %1938 }
 0x42d   : > { %v1940_v48 = vsub.f32 %v1935_v36, %v1939_v47 }
 0x42f   : > { %v1941_v49 = vmul.f32 1.442695, %v1940_v48 }
 0x431   : > { %3482 = vpow2.f32 %v1941_v49 }
 0x43b   : > { %v3483_v50 = vpop.eup %3482 }
 0x43c   : > { %v1943_v51 = vsel %vm1936_vm3, %v3483_v50, 0.0 }
 0x43d   : > { %1944 = vadd.xlane.f32.xlu0 %v1943_v51 }
 0x49f   : > { %v2053_v52 = vpop.xlane.xlu1 %2052 }
 0x4a0   : > { %v2054_v53 = vsub.f32 %v2050_v42, %v2053_v52 }
 0x4a2   : > { %v2055_v54 = vmul.f32 1.442695, %v2054_v53 }
 0x4a4   : > { %3484 = vpow2.f32 %v2055_v54 }
 0x4ae   : > { %v3485_v55 = vpop.eup %3484 }
 0x4af   : > { %v2057_v56 = vsel %vm1936_vm3, %v3485_v55, 0.0 }
 0x4b0   : > { %2058 = vadd.xlane.f32.xlu1 %v2057_v56 }
 0x4c1   : > { %2066 = vrot.lane.b32.xlu1 %v1950_v33, %s4087_s30 }
 0x4ca   : > { %v1945_v57 = vpop.xlane.xlu0 %1944 }
 0x4cb   : > { %3486 = vrcp.f32 %v1945_v57 }
 0x4d5   : > { %v3487_v58 = vpop.eup %3486 }
 0x4d6   : > { %v1947_v59 = vmul.f32 %v3487_v58, %v3483_v50 }
 0x4d8   : > { %1948 = vst.msk [vmem:[%s4904_s23] sm:$0xff] %vm1936_vm3, %v1947_v59  ;;  %v1949_v60 = vpack.c.bf16 %v1947_v59, %v1947_v59 }
 0x4da   : > { %3162 = vmatmul.mubr.msk.bf16.vlgmr.msra.gmra.mrb[12].mxu1 %vm1936_vm3, %v1949_v60 }
 0x4db   : > { %3173 = vmatprep.mubr.msk.bf16.mxu1 %vm4086_vm0, %v4085_v31 }
 0x53d   : > { %v2059_v61 = vpop.xlane.xlu1 %2058 }
 0x53e   : > { %3488 = vrcp.f32 %v2059_v61 }
 0x541   : > { %v2067_v62 = vpop.permute.xlu1 %2066 }
 0x542   : > { %v2072_v63 = vsel %vm1954_vm2, %v2067_v62, 0 }
 0x543   : > { %3172 = vmatpush3.bf16.msra.mxu1 %v2072_v63 }
 0x548   : > { %v3489_v0 = vpop.eup %3488 }
 0x549   : > { %v2061_v1 = vmul.f32 %v3489_v0, %v3485_v55 }
 0x54b   : > { %2962 = vst.msk [vmem:[%s4904_s23 + $0x8] sm:$0xff] %vm1936_vm3, %v2061_v1  ;;  %v2064_v2 = vpack.c.bf16 %v2061_v1, %v2061_v1 }
 0x54d   : > { %3174 = vmatmul.mubr.msk.bf16.vlgmr.msra.gmra.mrb[16].mxu1 %vm1936_vm3, %v2064_v2 }
 0x5ad   : > { %v1992_v3 = vpop.f32.mrb[12].mxu1 }
 0x5ae   : > { %v3163_v4 = vpop.f32.mrb[13].mxu1 }
 0x5af   : > { %v1995_v5 = vpop.f32.mrb[14].mxu1 }
 0x5b0   : > { %v3164_v6 = vpop.f32.mrb[15].mxu1 }
 0x620   : > { %v2108_v7 = vpop.f32.mrb[16].mxu1 }
 0x621   : > { %2115 = vrot.lane.b32.xlu1 %v2108_v7, %s4087_s30  ;;  %v3175_v31 = vpop.f32.mrb[17].mxu1 }
 0x622   : > { %v2111_v8 = vpop.f32.mrb[18].mxu1 }
 0x623   : > { %v3176_v9 = vpop.f32.mrb[19].mxu1 }
 0x68e   : > { %2122 = sbr.rel (%p2964_p8) target bundleno = 1685 (0x695), region = 112 }
 0x693   : > { %v2116_v10 = vpop.permute.xlu1 %2115 }
 0x694   : > { %v4917_v11 = vsel %vm1888_vm1, %v1992_v3, %v2116_v10 }
 0x695 PF: > { %v3490_v23 = vld [vmem:[%s4754_s9 + $0x4] ss:$16 sps:$4 sm:$0xff]   ;;  %v3492_v24 = vld [vmem:[%s4754_s9 + $0xc] ss:$16 sps:$4 sm:$0xff]   ;;  %v4088_v25 = vmov 0   ;;  %v2153_v57 = vpack.c.bf16 %v4917_v11, %v4917_v11  ;;  %s5223_s19 = sld [smem:[#allocation40_spill]] }
 0x696   : > { %2378 = vmatprep.mubr.bf16.mxu0 %v4088_v25  ;;  %2419 = vmatprep.mubr.bf16.mxu1 %v4088_v25  ;;  %v3494_v26 = vld [vmem:[%s4754_s9] ss:$16 sps:$4 sm:$0xff]   ;;  %v3495_v27 = vld [vmem:[%s4754_s9 + $0x8] ss:$16 sps:$4 sm:$0xff]   ;;  %v3496_v28 = vld [vmem:[%s4754_s9 + $0x24] ss:$16 sps:$4 sm:$0xff]  }
 0x697   : > { %2346 = vmatprep.subr.bf16.mxu0 %v3490_v23  ;;  %2387 = vmatprep.subr.bf16.mxu1 %v3492_v24  ;;  %v3498_v29 = vld [vmem:[%s4754_s9 + $0x2c] ss:$16 sps:$4 sm:$0xff]   ;;  %v3500_v30 = vld [vmem:[%s4754_s9 + $0x20] ss:$16 sps:$4 sm:$0xff]   ;;  %v3501_v32 = vld [vmem:[%s4754_s9 + $0x28] ss:$16 sps:$4 sm:$0xff]  }
 0x698   : > { %2347 = vmatpush1.bf16.msra.mxu0 %v3494_v26  ;;  %2388 = vmatpush1.bf16.msra.mxu1 %v3495_v27  ;;  %v3502_v33 = vld [vmem:[%s4754_s9 + $0x44] ss:$16 sps:$4 sm:$0xff]   ;;  %v3504_v34 = vld [vmem:[%s4754_s9 + $0x4c] ss:$16 sps:$4 sm:$0xff]   ;;  %v3506_v35 = vld [vmem:[%s4754_s9 + $0x40] ss:$16 sps:$4 sm:$0xff]  }
 0x699   : > { %2348 = vmatprep.subr.bf16.mxu0 %v3496_v28  ;;  %2389 = vmatprep.subr.bf16.mxu1 %v3498_v29  ;;  %v3507_v36 = vld [vmem:[%s4754_s9 + $0x48] ss:$16 sps:$4 sm:$0xff]   ;;  %v3508_v37 = vld [vmem:[%s4754_s9 + $0x64] ss:$16 sps:$4 sm:$0xff]   ;;  %v3510_v38 = vld [vmem:[%s4754_s9 + $0x6c] ss:$16 sps:$4 sm:$0xff]  }
 0x69a   : > { %v3512_v39 = vld [vmem:[%s4754_s9 + $0x60] ss:$16 sps:$4 sm:$0xff]   ;;  %v3513_v40 = vld [vmem:[%s4754_s9 + $0x68] ss:$16 sps:$4 sm:$0xff]   ;;  %v3514_v41 = vld [vmem:[%s4754_s9 + $0x84] ss:$16 sps:$4 sm:$0xff]  }
 0x69b   : > { %v3516_v42 = vld [vmem:[%s4754_s9 + $0x8c] ss:$16 sps:$4 sm:$0xff]   ;;  %v3518_v43 = vld [vmem:[%s4754_s9 + $0x80] ss:$16 sps:$4 sm:$0xff]   ;;  %v3519_v44 = vld [vmem:[%s4754_s9 + $0x88] ss:$16 sps:$4 sm:$0xff]  }
 0x69c   : > { %2349 = vmatpush1.bf16.msra.mxu0 %v3500_v30  ;;  %2390 = vmatpush1.bf16.msra.mxu1 %v3501_v32  ;;  %v3520_v45 = vld [vmem:[%s4754_s9 + $0xa4] ss:$16 sps:$4 sm:$0xff]   ;;  %v3522_v46 = vld [vmem:[%s4754_s9 + $0xac] ss:$16 sps:$4 sm:$0xff]   ;;  %v3524_v47 = vld [vmem:[%s4754_s9 + $0xa0] ss:$16 sps:$4 sm:$0xff]  }
 0x69d   : > { %2350 = vmatprep.subr.bf16.mxu0 %v3502_v33  ;;  %2391 = vmatprep.subr.bf16.mxu1 %v3504_v34  ;;  %v3525_v48 = vld [vmem:[%s4754_s9 + $0xa8] ss:$16 sps:$4 sm:$0xff]   ;;  %v3526_v49 = vld [vmem:[%s4754_s9 + $0xc4] ss:$16 sps:$4 sm:$0xff]   ;;  %v3528_v50 = vld [vmem:[%s4754_s9 + $0xcc] ss:$16 sps:$4 sm:$0xff]  }
 0x69e   : > { %v3530_v51 = vld [vmem:[%s4754_s9 + $0xc0] ss:$16 sps:$4 sm:$0xff]   ;;  %v3531_v52 = vld [vmem:[%s4754_s9 + $0xc8] ss:$16 sps:$4 sm:$0xff]   ;;  %v3532_v53 = vld [vmem:[%s4754_s9 + $0xe4] ss:$16 sps:$4 sm:$0xff]  }
 0x69f   : > { %v3534_v54 = vld [vmem:[%s4754_s9 + $0xec] ss:$16 sps:$4 sm:$0xff]   ;;  %v3536_v55 = vld [vmem:[%s4754_s9 + $0xe0] ss:$16 sps:$4 sm:$0xff]   ;;  %v3537_v56 = vld [vmem:[%s4754_s9 + $0xe8] ss:$16 sps:$4 sm:$0xff]  }
 0x6a0   : > { %2351 = vmatpush1.bf16.msra.mxu0 %v3506_v35  ;;  %2392 = vmatpush1.bf16.msra.mxu1 %v3507_v36  ;;  %v2149_v58 = vld [vmem:[#allocation2] sm:$0xff]  ;;  %v2151_v59 = vld [vmem:[#allocation2 + $0x10] sm:$0xff]  ;;  %v2150_v60 = vld [vmem:[#allocation2 + $0x8] sm:$0xff]  ;;  %p2997_p0 = scmp.ne.s32.totalorder %s5223_s19, 3 }
 0x6a1   : > { %2352 = vmatprep.subr.bf16.mxu0 %v3508_v37  ;;  %2393 = vmatprep.subr.bf16.mxu1 %v3510_v38  ;;  %v2152_v61 = vld [vmem:[#allocation2 + $0x18] sm:$0xff] }
 0x6a4   : > { %2353 = vmatpush1.bf16.msra.mxu0 %v3512_v39  ;;  %2394 = vmatpush1.bf16.msra.mxu1 %v3513_v40 }
 0x6a5   : > { %2354 = vmatprep.subr.bf16.mxu0 %v3514_v41  ;;  %2395 = vmatprep.subr.bf16.mxu1 %v3516_v42 }
 0x6a8   : > { %2355 = vmatpush1.bf16.msra.mxu0 %v3518_v43  ;;  %2396 = vmatpush1.bf16.msra.mxu1 %v3519_v44 }
 0x6a9   : > { %2356 = vmatprep.subr.bf16.mxu0 %v3520_v45  ;;  %2397 = vmatprep.subr.bf16.mxu1 %v3522_v46 }
 0x6ac   : > { %2357 = vmatpush1.bf16.msra.mxu0 %v3524_v47  ;;  %2398 = vmatpush1.bf16.msra.mxu1 %v3525_v48 }
 0x6ad   : > { %2358 = vmatprep.subr.bf16.mxu0 %v3526_v49  ;;  %2399 = vmatprep.subr.bf16.mxu1 %v3528_v50 }
 0x6b0   : > { %2359 = vmatpush1.bf16.msra.mxu0 %v3530_v51  ;;  %2400 = vmatpush1.bf16.msra.mxu1 %v3531_v52 }
 0x6b1   : > { %2360 = vmatprep.subr.bf16.mxu0 %v3532_v53  ;;  %2401 = vmatprep.subr.bf16.mxu1 %v3534_v54 }
 0x6b4   : > { %2361 = vmatpush1.bf16.msra.mxu0 %v3536_v55  ;;  %2402 = vmatpush1.bf16.msra.mxu1 %v3537_v56 }
 0x6b7   : > { %2379 = vmatmul.mubr.bf16.vlgmr.msra.gmra.mrb[20].mxu0 %v2153_v57  ;;  %2420 = vmatmul.mubr.bf16.vlgmr.msra.gmra.mrb[20].mxu1 %v2153_v57 }
 0x788   : > { %2439 = sbr.rel (%p2997_p0) target bundleno = 1943 (0x797), region = 116 }
 0x78a   : > { %v2380_v62 = vpop.f32.mrb[20].mxu0  ;;  %v2421_v63 = vpop.f32.mrb[20].mxu1 }
 0x78b   : > { %v2428_v0 = vadd.f32 %v2380_v62, %v2149_v58  ;;  %v2430_v1 = vadd.f32 %v2421_v63, %v2151_v59  ;;  %v2382_v2 = vpop.f32.mrb[21].mxu0  ;;  %v2423_v3 = vpop.f32.mrb[21].mxu1 }
 0x78c   : > { %v2429_v4 = vadd.f32 %v2382_v2, %v2150_v60  ;;  %v2431_v5 = vadd.f32 %v2423_v3, %v2152_v61  ;;  %v2384_v6 = vpop.f32.mrb[22].mxu0  ;;  %v2425_v7 = vpop.f32.mrb[22].mxu1 }
 0x78d   : > { %2432 = vst [vmem:[#allocation2] sm:$0xff] %v2428_v0  ;;  %2434 = vst [vmem:[#allocation2 + $0x10] sm:$0xff] %v2430_v1  ;;  %v2385_v31 = vpop.f32.mrb[23].mxu0  ;;  %v2426_v8 = vpop.f32.mrb[23].mxu1 }
 0x78e   : > { %2433 = vst [vmem:[#allocation2 + $0x8] sm:$0xff] %v2429_v4  ;;  %2435 = vst [vmem:[#allocation2 + $0x18] sm:$0xff] %v2431_v5 }
 0x794   : > { %v2440_v9 = vld [vmem:[#allocation2] sm:$0xff]  ;;  %v2442_v11 = vld [vmem:[#allocation2 + $0x10] sm:$0xff] }
 0x795   : > { %v2441_v10 = vld [vmem:[#allocation2 + $0x8] sm:$0xff]  ;;  %2444 = vst [vmem:[%s4921_s17] sm:$0xff] %v2440_v9  ;;  %2446 = vst [vmem:[%s4921_s17 + $0x10] sm:$0xff] %v2442_v11  ;;  %v2443_v12 = vld [vmem:[#allocation2 + $0x18] sm:$0xff] }
 0x796   : > { %2445 = vst [vmem:[%s4921_s17 + $0x8] sm:$0xff] %v2441_v10  ;;  %2447 = vst [vmem:[%s4921_s17 + $0x18] sm:$0xff] %v2443_v12 }
 0x797 PF: > { %s5224_s5 = sld [smem:[#allocation41_spill]]  ;;  %s5225_s24 = sld [smem:[#allocation52_spill]] }
 0x798   : > { %s5226_s20 = sld [smem:[#allocation63_spill]]  ;;  %s2470_s26 = sshll.u32 %s4921_s17, 4  ;;  %s2471_s26 = int_to_ptr.vmem [resolvable:$true] %s2470_s26 }
 0x799   : > { %s2449_s15 = scalar_lea.sflag [#allocation5], %s4711_s13  ;;  %s3866_s21 = scalar_lea.vmem %s2471_s26, 512 }
 0x79a   : > { %p3867_p12 = scmp.ne.s32.totalorder %s2471_s26, %s3866_s21  ;;  %s4089_s12 = smov [#allocation21]  }
 0x79b   : > { %s3870_s9 = sshll.u32 %s4089_s12, 4  ;;  %s3871_s9 = int_to_ptr.vmem [resolvable:$false] %s3870_s9 }
 0x79c   : > { %s3872_s28 = scalar_lea.vmem %s3871_s9, 1024  ;;  %p3873_p1 = scmp.lt.s32.totalorder %s2471_s26, %s3871_s9 }
 0x79d   : > { %s3012_s27 = sshll.u32 %s5224_s5, 9  ;;  %p5227_p10 = scmp.ne.s32.totalorder %s5225_s24, 0 }
 0x79e   : > { %s4967_s16 = scalar_lea.hbm %s5226_s20, %s3012_s27  ;;  %p3874_p7 = scmp.lt.s32.totalorder %s3872_s28, %s3866_s21 }
 0x79f   : > { %p3868_p5 = pnand %p3867_p12, %p5227_p10 }
 0x7a0   : > { %p3875_p11 = por %p3874_p7, %p3873_p1 }
 0x7a1   : > { %p3869_p3 = pneg %p3868_p5 }
 0x7a3   : > { %p3876_p4 = pnand %p3875_p11, %p3869_p3 }
 0x7a5   : > { %3879 = shalt.err (!%p3876_p4)
}
 0x7a6   : > { %s3880_s13 = scalar_lea.hbm %s4967_s16, 512  ;;  %s3884_s3 = scalar_lea.hbm %s5226_s20, 1024 }
 0x7a7   : > { %p3881_p9 = scmp.ne.s32.totalorder %s4967_s16, %s3880_s13  ;;  %p3885_p2 = scmp.lt.u32.totalorder %s4967_s16, %s5226_s20 }
 0x7a8   : > { %p3886_p8 = scmp.lt.u32.totalorder %s3884_s3, %s3880_s13  ;;  %p3888_p12 = scmp.lt.u32.totalorder %s3880_s13, %s4967_s16 }
 0x7a9   : > { %p3882_p13 = pnand %p3881_p9, %p5227_p10 }
 0x7aa   : > { %p3887_p0 = por %p3886_p8, %p3885_p2 }
 0x7ab   : > { %p3883_p6 = pneg %p3882_p13 }
 0x7ac   : > { %p3889_p5 = por %p3888_p12, %p3887_p0 }
 0x7ae   : > { %p3890_p3 = pnand %p3889_p5, %p3883_p6 }
 0x7b0   : > { %3893 = shalt.err (!%p3890_p3)
}
 0x7b1   : > { %s5228_s19 = sld [smem:[#allocation40_spill]]  ;;  %s5230_s22 = sld [smem:[#allocation48_spill]] }
 0x7b2   : > { %3201 = dma.vmem_to_hbm [thread:$0]  (%p5227_p10), %s2471_s26, 512, %s4967_s16, %s2449_s15  }
 0x7b3   : > { %s3003_s21 = sshll.u32 %s5224_s5, 3  ;;  %s2486_s9 = sshll.u32 %s4904_s23, 4  ;;  %s4991_s9 = int_to_ptr.vmem [resolvable:$true] %s2486_s9 }
 0x7b4   : > { %s5231_s8 = sld [smem:[#allocation64_spill]]  ;;  %s5000_s3 = scalar_lea.sflag [#allocation23], %s803_s10 }
 0x7b5   : > { %s3894_s17 = scalar_lea.vmem %s4991_s9, 256  ;;  %s4090_s23 = smov [#allocation22]  }
 0x7b6   : > { %p3895_p10 = scmp.ne.s32.totalorder %s4991_s9, %s3894_s17  ;;  %s3898_s5 = sshll.u32 %s4090_s23, 4  ;;  %s3899_s5 = int_to_ptr.vmem [resolvable:$false] %s3898_s5 }
 0x7b7   : > { %s3002_s25 = sshll.u32 %s5228_s19, 1  ;;  %p5232_p1 = scmp.ne.s32.totalorder %s5230_s22, 0 }
 0x7b8   : > { %s2483_s12 = sadd.s32 %s3003_s21, %s3002_s25  ;;  %s3900_s16 = scalar_lea.vmem %s3899_s5, 512 }
 0x7b9   : > { %s3004_s28 = sshll.u32 %s2483_s12, 7  ;;  %p3896_p7 = pnand %p3895_p10, %p5232_p1 }
 0x7ba   : > { %s4996_s24 = scalar_lea.hbm %s5231_s8, %s3004_s28  ;;  %p3901_p4 = scmp.lt.s32.totalorder %s4991_s9, %s3899_s5 }
 0x7bb   : > { %p3897_p11 = pneg %p3896_p7  ;;  %p3902_p9 = scmp.lt.s32.totalorder %s3900_s16, %s3894_s17 }
 0x7bd   : > { %p3903_p13 = por %p3902_p9, %p3901_p4 }
 0x7bf   : > { %p3904_p6 = pnand %p3903_p13, %p3897_p11 }
 0x7c1   : > { %3907 = shalt.err (!%p3904_p6)
}
 0x7c2   : > { %s3908_s10 = scalar_lea.hbm %s4996_s24, 256  ;;  %s3912_s18 = scalar_lea.hbm %s5231_s8, 2048 }
 0x7c3   : > { %p3909_p2 = scmp.ne.s32.totalorder %s4996_s24, %s3908_s10  ;;  %p3913_p12 = scmp.lt.u32.totalorder %s4996_s24, %s5231_s8 }
 0x7c4   : > { %p3914_p5 = scmp.lt.u32.totalorder %s3912_s18, %s3908_s10  ;;  %p3916_p10 = scmp.lt.u32.totalorder %s3908_s10, %s4996_s24 }
 0x7c5   : > { %p3910_p8 = pnand %p3909_p2, %p5232_p1 }
 0x7c6   : > { %p3915_p3 = por %p3914_p5, %p3913_p12 }
 0x7c7   : > { %p3911_p0 = pneg %p3910_p8 }
 0x7c8   : > { %p3917_p7 = por %p3916_p10, %p3915_p3 }
 0x7ca   : > { %p3918_p11 = pnand %p3917_p7, %p3911_p0 }
 0x7cc   : > { %3921 = shalt.err (!%p3918_p11)
}
 0x7cd   : > { %s4091_s25 = smov 128   ;;  %s4092_s21 = smov 8  }
 0x7ce   : > { %3202 = dma.vmem_to_hbm [thread:$0]  (%p5232_p1), %s4991_s9, 256, %s4996_s24, %s5000_s3, %s4091_s25, %s4091_s25, %s4092_s21  }
 0x7cf PF: > { %s5233_s12 = sld [smem:[#allocation43_spill]]  ;;  %s5234_s28 = sld [smem:[#allocation38_spill]] }
 0x7d0   : > { %s5235_s13 = sld [smem:[#allocation47_spill]] }
 0x7d5   : > { %p3250_p4 = scmp.ge.s32.totalorder %s5233_s12, 2  ;;  %s2501_s30 = sand.u32 1, %s5234_s28  }
 0x7d6   : > { %p5236_p9 = scmp.ne.s32.totalorder %s5235_s13, 0  ;;  %s2502_s17 = scalar_lea.sflag [#allocation5], %s2501_s30 }
 0x7d8   : > { %p3241_p13 = pnand %p3250_p4, %p5236_p9 }
 0x7da   : > { %4007 = dma.done.wait (!%p3241_p13), %s2502_s17, 512  }
 0x7db   : > { %4009 = vsyncadd (!%p3241_p13), %s2502_s17, 4294966784  ;;  %s5237_s23 = sld [smem:[#allocation33_spill]]  ;;  %s5238_s5 = sld [smem:[#allocation49_spill]] }
 0x7e1   : > { %s2510_s16 = sand.u32 1, %s5237_s23   ;;  %p5239_p6 = scmp.ne.s32.totalorder %s5238_s5, 0 }
 0x7e2   : > { %s2511_s10 = scalar_lea.sflag [#allocation23], %s2510_s16 }
 0x7e3   : > { %p3244_p2 = pnand %p3250_p4, %p5239_p6 }
 0x7e5   : > { %4011 = dma.done.wait (!%p3244_p2), %s2511_s10, 256  }
 0x7e6   : > { %4013 = vsyncadd (!%p3244_p2), %s2511_s10, 4294967040  ;;  %s47_s16 = sadd.s32 1, %s5233_s12   ;;  %s5241_s21 = sld [smem:[#allocation34_spill]] }
 0x7e7   : > { %p5032_p1 = scmp.ge.s32.totalorder %s47_s16, 10   ;;  %s5242_s9 = sld [smem:[#allocation35_spill]] }
 0x7e8   : > { %s5243_s23 = sld [smem:[#allocation56_spill]]  ;;  %s5245_s25 = sld [smem:[#allocation37_spill]] }
 0x7e9   : > { %s5244_s24 = sld [smem:[#allocation36_spill]]  ;;  %s5246_s26 = sld [smem:[#allocation54_spill]] }
 0x7ea   : > { %s5247_s27 = sld [smem:[#allocation39_spill]]  ;;  %s5248_s3 = sld [smem:[#allocation55_spill]] }
 0x7eb   : > { %s5249_s13 = sld [smem:[#allocation42_spill]]  ;;  %s5250_s15 = sld [smem:[#allocation51_spill]] }
 0x7ec   : > { %s5251_s18 = sld [smem:[#allocation53_spill]]  ;;  %s5254_s28 = smov %s4048_s29 }
 0x7ed   : > { %s5253_s22 = smov %s5242_s9  ;;  %s5256_s30 = smov %s4060_s14 }
 0x7ee   :  { %46 = sbr.rel (!%p5032_p1) target bundleno = 31 (0x1f), region = 248 }
 0x7f0   : > { %s5255_s29 = smov %s5248_s3 }
 0x7f1   : > { %s5257_s14 = smov %s5250_s15 }
 0x7f2   : > { %s5258_s15 = smov %s5251_s18 }
 0x7f5   :  { %2516 = vsyncpa [#allocation4], 1 }
 0x7f6   :  { %2518 = vsyncpa [#allocation4 + $0x1], 1 }
 0x7f7   :  { %2519 = vsyncpa [#allocation7], 1 }
 0x7f8   :  { %2521 = vsyncpa [#allocation7 + $0x1], 1 }
 0x7f9   :  { %2522 = vsyncpa [#allocation10], 1 }
 0x7fa   :  { %2524 = vsyncpa [#allocation10 + $0x1], 1 }
 0x7fb   :  { %2525 = vsyncpa [#allocation13], 1 }
 0x7fc   :  { %2527 = vsyncpa [#allocation13 + $0x1], 1 }
 0x7fd   :  { %2528 = vsyncpa [#allocation16], 1 }
 0x7fe   :  { %2530 = vsyncpa [#allocation16 + $0x1], 1 }
 0x7ff   :  { %2531 = vsyncpa [#allocation19], 1 }
 0x800   :  { %2533 = vsyncpa [#allocation19 + $0x1], 1 }
 0x801   :  { %2534 = vsyncpa [#allocation5], 1 }
 0x802   :  { %2536 = vsyncpa [#allocation5 + $0x1], 1 }
 0x803   :  { %2537 = vsyncpa [#allocation23], 1 }
 0x804   :  { %2539 = vsyncpa [#allocation23 + $0x1], 1 }

</bundles_post_ra>
